<compile_context>
chip_gen: v5e
topology: v5e:2x2
jax: 0.10.0
libtpu: 0.0.40
codegen_flags: <defaults>
</compile_context>

<pallas_src>
import math
import jax
import jax.numpy as jnp
from jax import lax
from jax.experimental import pallas as pl
from jax.experimental.pallas import tpu as pltpu

# ---- model hyper-parameters (small, synthetic) -------------------------------
VOCAB = 100
HIDDEN = 32
NUM_HEADS = 2
HEAD_DIM = HIDDEN // NUM_HEADS
FFN = 64
NUM_LAYERS = 2
MAX_SEQ = 8
LN_EPS = 1e-12
ATT_SCALE = 1.0 / math.sqrt(HEAD_DIM)


# ---- helpers used inside the kernel -------------------------------------------
def _layernorm(x, gamma, beta):
    mu = jnp.mean(x, axis=-1, keepdims=True)
    var = jnp.mean((x - mu) ** 2, axis=-1, keepdims=True)
    return (x - mu) * lax.rsqrt(var + LN_EPS) * gamma + beta


def _gelu(x):
    # TODO(synk): HF BERT default is the exact erf GELU; tanh approximation used here.
    return 0.5 * x * (1.0 + jnp.tanh(0.7978845608028654 * (x + 0.044715 * x * x * x)))


def _bf16(x):
    return x.astype(jnp.bfloat16)


# ---- fused Pallas kernel -------------------------------------------------------
def fused_encoder_kernel(x_ref, mask_ref,
                         emb_g_ref, emb_b_ref,
                         wqkv_ref, bqkv_ref,
                         wo_ref, bo_ref, g1_ref, be1_ref,
                         w1_ref, b1_ref, w2_ref, b2_ref, g2_ref, be2_ref,
                         out_ref):
    BS, H = x_ref.shape            # (B*S, H)
    B, S = mask_ref.shape          # (B, S)

    mask = mask_ref[...]           # (B, S) float, 1.0 = keep
    # additive attention key-bias, broadcast ONCE (hoisted out of the layer loop)
    attn_bias = jnp.broadcast_to(((1.0 - mask) * (-1e9))[:, None, :], (B, S, S))

    # embedding LayerNorm
    x = _layernorm(x_ref[...], emb_g_ref[...], emb_b_ref[...])       # (B*S, H) f32

    def layer_body(l, x):
        xb = _bf16(x)
        # fused QKV projection: one MXU pass instead of three narrow (H->H) ones
        qkv = jnp.dot(xb, wqkv_ref[l],
                      preferred_element_type=jnp.float32) + bqkv_ref[l]   # (B*S, 3H)
        q3 = qkv[:, 0 * H:1 * H].reshape(B, S, H)
        k3 = qkv[:, 1 * H:2 * H].reshape(B, S, H)
        v3 = qkv[:, 2 * H:3 * H].reshape(B, S, H)

        ctx_heads = []
        for h in range(NUM_HEADS):                       # static, tiny
            sl = slice(h * HEAD_DIM, (h + 1) * HEAD_DIM)
            qh = _bf16(q3[:, :, sl])                     # (B, S, Dh)
            kh = _bf16(k3[:, :, sl])
            vh = _bf16(v3[:, :, sl])
            # scores = q . k^T, contracting last dims (no explicit transpose of k)
            s = lax.dot_general(qh, kh, (((2,), (2,)), ((0,), (0,))),
                                preferred_element_type=jnp.float32)   # (B, S, S)
            s = s + attn_bias
            s = s - jnp.max(s, axis=-1, keepdims=True)
            p = jnp.exp(s)
            p = p * pl.reciprocal(jnp.sum(p, axis=-1, keepdims=True), approx=True)
            ctx = lax.dot_general(_bf16(p), vh, (((2,), (1,)), ((0,), (0,))),
                                  preferred_element_type=jnp.float32)  # (B, S, Dh)
            ctx_heads.append(ctx)

        ctx = jnp.concatenate(ctx_heads, axis=-1).reshape(BS, H)       # (B*S, H)
        attn = jnp.dot(_bf16(ctx), wo_ref[l],
                       preferred_element_type=jnp.float32) + bo_ref[l]

        y = _layernorm(x + attn, g1_ref[l], be1_ref[l])

        h1 = jnp.dot(_bf16(y), w1_ref[l],
                     preferred_element_type=jnp.float32) + b1_ref[l]
        h1 = _gelu(h1)
        ff = jnp.dot(_bf16(h1), w2_ref[l],
                     preferred_element_type=jnp.float32) + b2_ref[l]
        return _layernorm(y + ff, g2_ref[l], be2_ref[l])

    x = lax.fori_loop(0, NUM_LAYERS, layer_body, x, unroll=True)

    # MeanPooling: masked mean over the sequence axis -> (B, H) output
    h3 = x.reshape(B, S, H)
    summed = jnp.sum(h3 * mask[:, :, None], axis=1)                    # (B, H)
    denom = jnp.maximum(jnp.sum(mask, axis=1, keepdims=True), 1e-9)    # (B, 1)
    out_ref[...] = summed * pl.reciprocal(denom, approx=True)


# ---- parameters ----------------------------------------------------------------
def init_params(key):
    keys = iter(jax.random.split(key, 8))

    def dense(shape):
        return 0.02 * jax.random.normal(next(keys), shape, jnp.float32)

    L, H, F = NUM_LAYERS, HIDDEN, FFN
    zeros = lambda s: jnp.zeros(s, jnp.float32)
    ones = lambda s: jnp.ones(s, jnp.float32)

    word_emb = dense((VOCAB, H))
    pos_emb = dense((MAX_SEQ, H))
    # 1/sqrt(head_dim) folded into the Q columns once at init time
    wq = dense((L, H, H)) * ATT_SCALE
    wk = dense((L, H, H))
    wv = dense((L, H, H))

    return {
        "word_emb": word_emb,
        "pos_emb": pos_emb,
        "emb_ln_g": ones((1, H)),
        "emb_ln_b": zeros((1, H)),
        # fused QKV projection weight (in, 3*out), bf16 for the MXU
        "wqkv": jnp.concatenate([wq, wk, wv], axis=-1).astype(jnp.bfloat16),
        "bqkv": zeros((L, 1, 3 * H)),
        "wo": dense((L, H, H)).astype(jnp.bfloat16),
        "bo": zeros((L, 1, H)),
        "ln1_g": ones((L, 1, H)),
        "ln1_b": zeros((L, 1, H)),
        "w1": dense((L, H, F)).astype(jnp.bfloat16),
        "b1": zeros((L, 1, F)),
        "w2": dense((L, F, H)).astype(jnp.bfloat16),
        "b2": zeros((L, 1, H)),
        "ln2_g": ones((L, 1, H)),
        "ln2_b": zeros((L, 1, H)),
    }


# ---- forward -------------------------------------------------------------------
def sentence_transformer_forward(params, input_ids, attention_mask):
    """Backbone forward -> last_hidden_state, then MeanPooling -> (B, H)."""
    B, S = input_ids.shape
    mask_f = attention_mask.astype(jnp.float32)

    # embedding gather + add stay in plain JAX (tiny glue); everything else is fused
    tok = jnp.take(params["word_emb"], input_ids, axis=0)          # (B, S, H)
    pos = params["pos_emb"][None, :S, :]                           # (1, S, H)
    # TODO(synk): token_type embeddings omitted (single-segment input assumed).
    x0 = (tok + pos).reshape(B * S, HIDDEN)

    args = (x0, mask_f,
            params["emb_ln_g"], params["emb_ln_b"],
            params["wqkv"], params["bqkv"],
            params["wo"], params["bo"],
            params["ln1_g"], params["ln1_b"],
            params["w1"], params["b1"], params["w2"], params["b2"],
            params["ln2_g"], params["ln2_b"])

    vmem = pl.BlockSpec(memory_space=pltpu.MemorySpace.VMEM)
    return pl.pallas_call(
        fused_encoder_kernel,
        out_shape=jax.ShapeDtypeStruct((B, HIDDEN), jnp.float32),
        in_specs=[vmem] * len(args),
        out_specs=vmem,
    )(*args)


if __name__ == "__main__":
    B, S = 2, MAX_SEQ
    key = jax.random.PRNGKey(0)
    k_ids, k_params = jax.random.split(key)

    input_ids = jax.random.randint(k_ids, (B, S), 0, VOCAB, dtype=jnp.int32)
    attention_mask = jnp.array([[1, 1, 1, 1, 1, 1, 0, 0],
                                [1, 1, 1, 1, 0, 0, 0, 0]], dtype=jnp.int32)

    params = init_params(k_params)
    emb = jax.jit(sentence_transformer_forward)(params, input_ids, attention_mask)
    jax.block_until_ready(emb)
    assert emb.shape == (B, HIDDEN) and emb.dtype == jnp.float32
    print("KERNEL_OK")
</pallas_src>

<mosaic_0001>
module attributes {stable_mosaic.version = 11 : i64} {
  func.func @fused_encoder_kernel(%arg0: memref<16x32xf32, #tpu.memory_space<vmem>>, %arg1: memref<2x8xf32, #tpu.memory_space<vmem>>, %arg2: memref<1x32xf32, #tpu.memory_space<vmem>>, %arg3: memref<1x32xf32, #tpu.memory_space<vmem>>, %arg4: memref<2x32x96xbf16, #tpu.memory_space<vmem>>, %arg5: memref<2x1x96xf32, #tpu.memory_space<vmem>>, %arg6: memref<2x32x32xbf16, #tpu.memory_space<vmem>>, %arg7: memref<2x1x32xf32, #tpu.memory_space<vmem>>, %arg8: memref<2x1x32xf32, #tpu.memory_space<vmem>>, %arg9: memref<2x1x32xf32, #tpu.memory_space<vmem>>, %arg10: memref<2x32x64xbf16, #tpu.memory_space<vmem>>, %arg11: memref<2x1x64xf32, #tpu.memory_space<vmem>>, %arg12: memref<2x64x32xbf16, #tpu.memory_space<vmem>>, %arg13: memref<2x1x32xf32, #tpu.memory_space<vmem>>, %arg14: memref<2x1x32xf32, #tpu.memory_space<vmem>>, %arg15: memref<2x1x32xf32, #tpu.memory_space<vmem>>, %arg16: memref<2x32xf32, #tpu.memory_space<vmem>>) attributes {dimension_semantics = [], scalar_prefetch = 0 : i64, scratch_operands = 0 : i64, tpu.core_type = #tpu.core_type<tc>} {
    %c0 = arith.constant 0 : index
    %c0_0 = arith.constant 0 : index
    %0 = vector.load %arg1[%c0, %c0_0] : memref<2x8xf32, #tpu.memory_space<vmem>>, vector<2x8xf32>
    %cst = arith.constant 1.000000e+00 : f32
    %1 = vector.broadcast %cst : f32 to vector<2x8xf32>
    %2 = arith.subf %1, %0 : vector<2x8xf32>
    %cst_1 = arith.constant -1.000000e+09 : f32
    %3 = vector.broadcast %cst_1 : f32 to vector<2x8xf32>
    %4 = arith.mulf %2, %3 : vector<2x8xf32>
    %5 = vector.shape_cast %4 : vector<2x8xf32> to vector<2x1x8xf32>
    %6 = vector.shape_cast %5 : vector<2x1x8xf32> to vector<2x1x8xf32>
    %7 = vector.broadcast %6 : vector<2x1x8xf32> to vector<2x8x8xf32>
    %c0_2 = arith.constant 0 : index
    %c0_3 = arith.constant 0 : index
    %8 = vector.load %arg0[%c0_2, %c0_3] : memref<16x32xf32, #tpu.memory_space<vmem>>, vector<16x32xf32>
    %c0_4 = arith.constant 0 : index
    %c0_5 = arith.constant 0 : index
    %9 = vector.load %arg2[%c0_4, %c0_5] : memref<1x32xf32, #tpu.memory_space<vmem>>, vector<1x32xf32>
    %c0_6 = arith.constant 0 : index
    %c0_7 = arith.constant 0 : index
    %10 = vector.load %arg3[%c0_6, %c0_7] : memref<1x32xf32, #tpu.memory_space<vmem>>, vector<1x32xf32>
    %cst_8 = arith.constant dense<0.000000e+00> : vector<16xf32>
    %11 = vector.multi_reduction <add>, %8, %cst_8 [1] : vector<16x32xf32> to vector<16xf32>
    %12 = vector.shape_cast %11 : vector<16xf32> to vector<16x1xf32>
    %cst_9 = arith.constant 3.200000e+01 : f32
    %13 = vector.broadcast %cst_9 : f32 to vector<16x1xf32>
    %14 = arith.divf %12, %13 : vector<16x1xf32>
    %15 = vector.broadcast %14 : vector<16x1xf32> to vector<16x32xf32>
    %16 = arith.subf %8, %15 : vector<16x32xf32>
    %17 = arith.mulf %16, %16 : vector<16x32xf32>
    %cst_10 = arith.constant dense<0.000000e+00> : vector<16xf32>
    %18 = vector.multi_reduction <add>, %17, %cst_10 [1] : vector<16x32xf32> to vector<16xf32>
    %19 = vector.shape_cast %18 : vector<16xf32> to vector<16x1xf32>
    %cst_11 = arith.constant 3.200000e+01 : f32
    %20 = vector.broadcast %cst_11 : f32 to vector<16x1xf32>
    %21 = arith.divf %19, %20 : vector<16x1xf32>
    %22 = vector.broadcast %14 : vector<16x1xf32> to vector<16x32xf32>
    %23 = arith.subf %8, %22 : vector<16x32xf32>
    %cst_12 = arith.constant 9.99999996E-13 : f32
    %24 = vector.broadcast %cst_12 : f32 to vector<16x1xf32>
    %25 = arith.addf %21, %24 : vector<16x1xf32>
    %26 = math.rsqrt %25 : vector<16x1xf32>
    %27 = vector.broadcast %26 : vector<16x1xf32> to vector<16x32xf32>
    %28 = arith.mulf %23, %27 : vector<16x32xf32>
    %29 = vector.broadcast %9 : vector<1x32xf32> to vector<16x32xf32>
    %30 = arith.mulf %28, %29 : vector<16x32xf32>
    %31 = vector.broadcast %10 : vector<1x32xf32> to vector<16x32xf32>
    %32 = arith.addf %30, %31 : vector<16x32xf32>
    %c0_i32 = arith.constant 0 : i32
    %33 = arith.truncf %32 : vector<16x32xf32> to vector<16x32xbf16>
    %34 = arith.index_cast %c0_i32 : i32 to index
    %c0_13 = arith.constant 0 : index
    %c0_14 = arith.constant 0 : index
    %35 = vector.load %arg4[%34, %c0_13, %c0_14] : memref<2x32x96xbf16, #tpu.memory_space<vmem>>, vector<1x32x96xbf16>
    %36 = vector.shape_cast %35 : vector<1x32x96xbf16> to vector<32x96xbf16>
    %cst_15 = arith.constant dense<0.000000e+00> : vector<16x96xf32>
    %37 = tpu.matmul %33, %36, %cst_15 {dimension_numbers = #tpu.dot_dimension_numbers<[1], [0], [0], [1], [0, 0, 1, 1], [], []>} : vector<16x32xbf16>, vector<32x96xbf16>, vector<16x96xf32> -> vector<16x96xf32>
    %38 = arith.index_cast %c0_i32 : i32 to index
    %c0_16 = arith.constant 0 : index
    %c0_17 = arith.constant 0 : index
    %39 = vector.load %arg5[%38, %c0_16, %c0_17] : memref<2x1x96xf32, #tpu.memory_space<vmem>>, vector<1x1x96xf32>
    %40 = vector.shape_cast %39 : vector<1x1x96xf32> to vector<1x96xf32>
    %41 = vector.broadcast %40 : vector<1x96xf32> to vector<16x96xf32>
    %42 = arith.addf %37, %41 : vector<16x96xf32>
    %43 = vector.extract_strided_slice %42 {offsets = [0, 0], sizes = [16, 32], strides = [1, 1]} : vector<16x96xf32> to vector<16x32xf32>
    %44 = vector.shape_cast %43 : vector<16x32xf32> to vector<2x8x32xf32>
    %45 = vector.extract_strided_slice %42 {offsets = [0, 32], sizes = [16, 32], strides = [1, 1]} : vector<16x96xf32> to vector<16x32xf32>
    %46 = vector.shape_cast %45 : vector<16x32xf32> to vector<2x8x32xf32>
    %47 = vector.extract_strided_slice %42 {offsets = [0, 64], sizes = [16, 32], strides = [1, 1]} : vector<16x96xf32> to vector<16x32xf32>
    %48 = vector.shape_cast %47 : vector<16x32xf32> to vector<2x8x32xf32>
    %49 = vector.extract_strided_slice %44 {offsets = [0, 0, 0], sizes = [2, 8, 16], strides = [1, 1, 1]} : vector<2x8x32xf32> to vector<2x8x16xf32>
    %50 = arith.truncf %49 : vector<2x8x16xf32> to vector<2x8x16xbf16>
    %51 = vector.extract_strided_slice %46 {offsets = [0, 0, 0], sizes = [2, 8, 16], strides = [1, 1, 1]} : vector<2x8x32xf32> to vector<2x8x16xf32>
    %52 = arith.truncf %51 : vector<2x8x16xf32> to vector<2x8x16xbf16>
    %53 = vector.extract_strided_slice %48 {offsets = [0, 0, 0], sizes = [2, 8, 16], strides = [1, 1, 1]} : vector<2x8x32xf32> to vector<2x8x16xf32>
    %54 = arith.truncf %53 : vector<2x8x16xf32> to vector<2x8x16xbf16>
    %cst_18 = arith.constant dense<0.000000e+00> : vector<2x8x8xf32>
    %55 = tpu.matmul %50, %52, %cst_18 {dimension_numbers = #tpu.dot_dimension_numbers<[2], [2], [1], [1], [0, 0, 0, 1, 1, 1], [0], [0]>} : vector<2x8x16xbf16>, vector<2x8x16xbf16>, vector<2x8x8xf32> -> vector<2x8x8xf32>
    %56 = arith.addf %55, %7 : vector<2x8x8xf32>
    %cst_19 = arith.constant dense<0xFF800000> : vector<2x8xf32>
    %57 = vector.multi_reduction <maximumf>, %56, %cst_19 [2] : vector<2x8x8xf32> to vector<2x8xf32>
    %58 = vector.shape_cast %57 : vector<2x8xf32> to vector<2x8x1xf32>
    %59 = vector.broadcast %58 : vector<2x8x1xf32> to vector<2x8x8xf32>
    %60 = arith.subf %56, %59 : vector<2x8x8xf32>
    %61 = math.exp %60 : vector<2x8x8xf32>
    %cst_20 = arith.constant dense<0.000000e+00> : vector<2x8xf32>
    %62 = vector.multi_reduction <add>, %61, %cst_20 [2] : vector<2x8x8xf32> to vector<2x8xf32>
    %63 = vector.shape_cast %62 : vector<2x8xf32> to vector<2x8x1xf32>
    %64 = tpu.reciprocal %63 {approx = true} : vector<2x8x1xf32> -> vector<2x8x1xf32>
    %65 = vector.broadcast %64 : vector<2x8x1xf32> to vector<2x8x8xf32>
    %66 = arith.mulf %61, %65 : vector<2x8x8xf32>
    %67 = arith.truncf %66 : vector<2x8x8xf32> to vector<2x8x8xbf16>
    %cst_21 = arith.constant dense<0.000000e+00> : vector<2x8x16xf32>
    %68 = tpu.matmul %67, %54, %cst_21 {dimension_numbers = #tpu.dot_dimension_numbers<[2], [1], [1], [2], [0, 0, 0, 1, 1, 2], [0], [0]>} : vector<2x8x8xbf16>, vector<2x8x16xbf16>, vector<2x8x16xf32> -> vector<2x8x16xf32>
    %69 = vector.extract_strided_slice %44 {offsets = [0, 0, 16], sizes = [2, 8, 16], strides = [1, 1, 1]} : vector<2x8x32xf32> to vector<2x8x16xf32>
    %70 = arith.truncf %69 : vector<2x8x16xf32> to vector<2x8x16xbf16>
    %71 = vector.extract_strided_slice %46 {offsets = [0, 0, 16], sizes = [2, 8, 16], strides = [1, 1, 1]} : vector<2x8x32xf32> to vector<2x8x16xf32>
    %72 = arith.truncf %71 : vector<2x8x16xf32> to vector<2x8x16xbf16>
    %73 = vector.extract_strided_slice %48 {offsets = [0, 0, 16], sizes = [2, 8, 16], strides = [1, 1, 1]} : vector<2x8x32xf32> to vector<2x8x16xf32>
    %74 = arith.truncf %73 : vector<2x8x16xf32> to vector<2x8x16xbf16>
    %cst_22 = arith.constant dense<0.000000e+00> : vector<2x8x8xf32>
    %75 = tpu.matmul %70, %72, %cst_22 {dimension_numbers = #tpu.dot_dimension_numbers<[2], [2], [1], [1], [0, 0, 0, 1, 1, 1], [0], [0]>} : vector<2x8x16xbf16>, vector<2x8x16xbf16>, vector<2x8x8xf32> -> vector<2x8x8xf32>
    %76 = arith.addf %75, %7 : vector<2x8x8xf32>
    %cst_23 = arith.constant dense<0xFF800000> : vector<2x8xf32>
    %77 = vector.multi_reduction <maximumf>, %76, %cst_23 [2] : vector<2x8x8xf32> to vector<2x8xf32>
    %78 = vector.shape_cast %77 : vector<2x8xf32> to vector<2x8x1xf32>
    %79 = vector.broadcast %78 : vector<2x8x1xf32> to vector<2x8x8xf32>
    %80 = arith.subf %76, %79 : vector<2x8x8xf32>
    %81 = math.exp %80 : vector<2x8x8xf32>
    %cst_24 = arith.constant dense<0.000000e+00> : vector<2x8xf32>
    %82 = vector.multi_reduction <add>, %81, %cst_24 [2] : vector<2x8x8xf32> to vector<2x8xf32>
    %83 = vector.shape_cast %82 : vector<2x8xf32> to vector<2x8x1xf32>
    %84 = tpu.reciprocal %83 {approx = true} : vector<2x8x1xf32> -> vector<2x8x1xf32>
    %85 = vector.broadcast %84 : vector<2x8x1xf32> to vector<2x8x8xf32>
    %86 = arith.mulf %81, %85 : vector<2x8x8xf32>
    %87 = arith.truncf %86 : vector<2x8x8xf32> to vector<2x8x8xbf16>
    %cst_25 = arith.constant dense<0.000000e+00> : vector<2x8x16xf32>
    %88 = tpu.matmul %87, %74, %cst_25 {dimension_numbers = #tpu.dot_dimension_numbers<[2], [1], [1], [2], [0, 0, 0, 1, 1, 2], [0], [0]>} : vector<2x8x8xbf16>, vector<2x8x16xbf16>, vector<2x8x16xf32> -> vector<2x8x16xf32>
    %89 = tpu.concatenate %68, %88 in 2 : vector<2x8x16xf32>, vector<2x8x16xf32> -> vector<2x8x32xf32>
    %90 = vector.shape_cast %89 : vector<2x8x32xf32> to vector<16x32xf32>
    %91 = arith.truncf %90 : vector<16x32xf32> to vector<16x32xbf16>
    %92 = arith.index_cast %c0_i32 : i32 to index
    %c0_26 = arith.constant 0 : index
    %c0_27 = arith.constant 0 : index
    %93 = vector.load %arg6[%92, %c0_26, %c0_27] : memref<2x32x32xbf16, #tpu.memory_space<vmem>>, vector<1x32x32xbf16>
    %94 = vector.shape_cast %93 : vector<1x32x32xbf16> to vector<32x32xbf16>
    %cst_28 = arith.constant dense<0.000000e+00> : vector<16x32xf32>
    %95 = tpu.matmul %91, %94, %cst_28 {dimension_numbers = #tpu.dot_dimension_numbers<[1], [0], [0], [1], [0, 0, 1, 1], [], []>} : vector<16x32xbf16>, vector<32x32xbf16>, vector<16x32xf32> -> vector<16x32xf32>
    %96 = arith.index_cast %c0_i32 : i32 to index
    %c0_29 = arith.constant 0 : index
    %c0_30 = arith.constant 0 : index
    %97 = vector.load %arg7[%96, %c0_29, %c0_30] : memref<2x1x32xf32, #tpu.memory_space<vmem>>, vector<1x1x32xf32>
    %98 = vector.shape_cast %97 : vector<1x1x32xf32> to vector<1x32xf32>
    %99 = vector.broadcast %98 : vector<1x32xf32> to vector<16x32xf32>
    %100 = arith.addf %95, %99 : vector<16x32xf32>
    %101 = arith.addf %32, %100 : vector<16x32xf32>
    %102 = arith.index_cast %c0_i32 : i32 to index
    %c0_31 = arith.constant 0 : index
    %c0_32 = arith.constant 0 : index
    %103 = vector.load %arg8[%102, %c0_31, %c0_32] : memref<2x1x32xf32, #tpu.memory_space<vmem>>, vector<1x1x32xf32>
    %104 = vector.shape_cast %103 : vector<1x1x32xf32> to vector<1x32xf32>
    %105 = arith.index_cast %c0_i32 : i32 to index
    %c0_33 = arith.constant 0 : index
    %c0_34 = arith.constant 0 : index
    %106 = vector.load %arg9[%105, %c0_33, %c0_34] : memref<2x1x32xf32, #tpu.memory_space<vmem>>, vector<1x1x32xf32>
    %107 = vector.shape_cast %106 : vector<1x1x32xf32> to vector<1x32xf32>
    %cst_35 = arith.constant dense<0.000000e+00> : vector<16xf32>
    %108 = vector.multi_reduction <add>, %101, %cst_35 [1] : vector<16x32xf32> to vector<16xf32>
    %109 = vector.shape_cast %108 : vector<16xf32> to vector<16x1xf32>
    %cst_36 = arith.constant 3.200000e+01 : f32
    %110 = vector.broadcast %cst_36 : f32 to vector<16x1xf32>
    %111 = arith.divf %109, %110 : vector<16x1xf32>
    %112 = vector.broadcast %111 : vector<16x1xf32> to vector<16x32xf32>
    %113 = arith.subf %101, %112 : vector<16x32xf32>
    %114 = arith.mulf %113, %113 : vector<16x32xf32>
    %cst_37 = arith.constant dense<0.000000e+00> : vector<16xf32>
    %115 = vector.multi_reduction <add>, %114, %cst_37 [1] : vector<16x32xf32> to vector<16xf32>
    %116 = vector.shape_cast %115 : vector<16xf32> to vector<16x1xf32>
    %cst_38 = arith.constant 3.200000e+01 : f32
    %117 = vector.broadcast %cst_38 : f32 to vector<16x1xf32>
    %118 = arith.divf %116, %117 : vector<16x1xf32>
    %119 = vector.broadcast %111 : vector<16x1xf32> to vector<16x32xf32>
    %120 = arith.subf %101, %119 : vector<16x32xf32>
    %cst_39 = arith.constant 9.99999996E-13 : f32
    %121 = vector.broadcast %cst_39 : f32 to vector<16x1xf32>
    %122 = arith.addf %118, %121 : vector<16x1xf32>
    %123 = math.rsqrt %122 : vector<16x1xf32>
    %124 = vector.broadcast %123 : vector<16x1xf32> to vector<16x32xf32>
    %125 = arith.mulf %120, %124 : vector<16x32xf32>
    %126 = vector.broadcast %104 : vector<1x32xf32> to vector<16x32xf32>
    %127 = arith.mulf %125, %126 : vector<16x32xf32>
    %128 = vector.broadcast %107 : vector<1x32xf32> to vector<16x32xf32>
    %129 = arith.addf %127, %128 : vector<16x32xf32>
    %130 = arith.truncf %129 : vector<16x32xf32> to vector<16x32xbf16>
    %131 = arith.index_cast %c0_i32 : i32 to index
    %c0_40 = arith.constant 0 : index
    %c0_41 = arith.constant 0 : index
    %132 = vector.load %arg10[%131, %c0_40, %c0_41] : memref<2x32x64xbf16, #tpu.memory_space<vmem>>, vector<1x32x64xbf16>
    %133 = vector.shape_cast %132 : vector<1x32x64xbf16> to vector<32x64xbf16>
    %cst_42 = arith.constant dense<0.000000e+00> : vector<16x64xf32>
    %134 = tpu.matmul %130, %133, %cst_42 {dimension_numbers = #tpu.dot_dimension_numbers<[1], [0], [0], [1], [0, 0, 1, 1], [], []>} : vector<16x32xbf16>, vector<32x64xbf16>, vector<16x64xf32> -> vector<16x64xf32>
    %135 = arith.index_cast %c0_i32 : i32 to index
    %c0_43 = arith.constant 0 : index
    %c0_44 = arith.constant 0 : index
    %136 = vector.load %arg11[%135, %c0_43, %c0_44] : memref<2x1x64xf32, #tpu.memory_space<vmem>>, vector<1x1x64xf32>
    %137 = vector.shape_cast %136 : vector<1x1x64xf32> to vector<1x64xf32>
    %138 = vector.broadcast %137 : vector<1x64xf32> to vector<16x64xf32>
    %139 = arith.addf %134, %138 : vector<16x64xf32>
    %cst_45 = arith.constant 5.000000e-01 : f32
    %140 = vector.broadcast %cst_45 : f32 to vector<16x64xf32>
    %141 = arith.mulf %140, %139 : vector<16x64xf32>
    %cst_46 = arith.constant 4.471500e-02 : f32
    %142 = vector.broadcast %cst_46 : f32 to vector<16x64xf32>
    %143 = arith.mulf %142, %139 : vector<16x64xf32>
    %144 = arith.mulf %143, %139 : vector<16x64xf32>
    %145 = arith.mulf %144, %139 : vector<16x64xf32>
    %146 = arith.addf %139, %145 : vector<16x64xf32>
    %cst_47 = arith.constant 0.797884583 : f32
    %147 = vector.broadcast %cst_47 : f32 to vector<16x64xf32>
    %148 = arith.mulf %147, %146 : vector<16x64xf32>
    %149 = math.tanh %148 : vector<16x64xf32>
    %cst_48 = arith.constant 1.000000e+00 : f32
    %150 = vector.broadcast %cst_48 : f32 to vector<16x64xf32>
    %151 = arith.addf %150, %149 : vector<16x64xf32>
    %152 = arith.mulf %141, %151 : vector<16x64xf32>
    %153 = arith.truncf %152 : vector<16x64xf32> to vector<16x64xbf16>
    %154 = arith.index_cast %c0_i32 : i32 to index
    %c0_49 = arith.constant 0 : index
    %c0_50 = arith.constant 0 : index
    %155 = vector.load %arg12[%154, %c0_49, %c0_50] : memref<2x64x32xbf16, #tpu.memory_space<vmem>>, vector<1x64x32xbf16>
    %156 = vector.shape_cast %155 : vector<1x64x32xbf16> to vector<64x32xbf16>
    %cst_51 = arith.constant dense<0.000000e+00> : vector<16x32xf32>
    %157 = tpu.matmul %153, %156, %cst_51 {dimension_numbers = #tpu.dot_dimension_numbers<[1], [0], [0], [1], [0, 0, 1, 1], [], []>} : vector<16x64xbf16>, vector<64x32xbf16>, vector<16x32xf32> -> vector<16x32xf32>
    %158 = arith.index_cast %c0_i32 : i32 to index
    %c0_52 = arith.constant 0 : index
    %c0_53 = arith.constant 0 : index
    %159 = vector.load %arg13[%158, %c0_52, %c0_53] : memref<2x1x32xf32, #tpu.memory_space<vmem>>, vector<1x1x32xf32>
    %160 = vector.shape_cast %159 : vector<1x1x32xf32> to vector<1x32xf32>
    %161 = vector.broadcast %160 : vector<1x32xf32> to vector<16x32xf32>
    %162 = arith.addf %157, %161 : vector<16x32xf32>
    %163 = arith.addf %129, %162 : vector<16x32xf32>
    %164 = arith.index_cast %c0_i32 : i32 to index
    %c0_54 = arith.constant 0 : index
    %c0_55 = arith.constant 0 : index
    %165 = vector.load %arg14[%164, %c0_54, %c0_55] : memref<2x1x32xf32, #tpu.memory_space<vmem>>, vector<1x1x32xf32>
    %166 = vector.shape_cast %165 : vector<1x1x32xf32> to vector<1x32xf32>
    %167 = arith.index_cast %c0_i32 : i32 to index
    %c0_56 = arith.constant 0 : index
    %c0_57 = arith.constant 0 : index
    %168 = vector.load %arg15[%167, %c0_56, %c0_57] : memref<2x1x32xf32, #tpu.memory_space<vmem>>, vector<1x1x32xf32>
    %169 = vector.shape_cast %168 : vector<1x1x32xf32> to vector<1x32xf32>
    %cst_58 = arith.constant dense<0.000000e+00> : vector<16xf32>
    %170 = vector.multi_reduction <add>, %163, %cst_58 [1] : vector<16x32xf32> to vector<16xf32>
    %171 = vector.shape_cast %170 : vector<16xf32> to vector<16x1xf32>
    %cst_59 = arith.constant 3.200000e+01 : f32
    %172 = vector.broadcast %cst_59 : f32 to vector<16x1xf32>
    %173 = arith.divf %171, %172 : vector<16x1xf32>
    %174 = vector.broadcast %173 : vector<16x1xf32> to vector<16x32xf32>
    %175 = arith.subf %163, %174 : vector<16x32xf32>
    %176 = arith.mulf %175, %175 : vector<16x32xf32>
    %cst_60 = arith.constant dense<0.000000e+00> : vector<16xf32>
    %177 = vector.multi_reduction <add>, %176, %cst_60 [1] : vector<16x32xf32> to vector<16xf32>
    %178 = vector.shape_cast %177 : vector<16xf32> to vector<16x1xf32>
    %cst_61 = arith.constant 3.200000e+01 : f32
    %179 = vector.broadcast %cst_61 : f32 to vector<16x1xf32>
    %180 = arith.divf %178, %179 : vector<16x1xf32>
    %181 = vector.broadcast %173 : vector<16x1xf32> to vector<16x32xf32>
    %182 = arith.subf %163, %181 : vector<16x32xf32>
    %cst_62 = arith.constant 9.99999996E-13 : f32
    %183 = vector.broadcast %cst_62 : f32 to vector<16x1xf32>
    %184 = arith.addf %180, %183 : vector<16x1xf32>
    %185 = math.rsqrt %184 : vector<16x1xf32>
    %186 = vector.broadcast %185 : vector<16x1xf32> to vector<16x32xf32>
    %187 = arith.mulf %182, %186 : vector<16x32xf32>
    %188 = vector.broadcast %166 : vector<1x32xf32> to vector<16x32xf32>
    %189 = arith.mulf %187, %188 : vector<16x32xf32>
    %190 = vector.broadcast %169 : vector<1x32xf32> to vector<16x32xf32>
    %191 = arith.addf %189, %190 : vector<16x32xf32>
    %c1_i32 = arith.constant 1 : i32
    %192 = arith.truncf %191 : vector<16x32xf32> to vector<16x32xbf16>
    %193 = arith.index_cast %c1_i32 : i32 to index
    %c0_63 = arith.constant 0 : index
    %c0_64 = arith.constant 0 : index
    %194 = vector.load %arg4[%193, %c0_63, %c0_64] : memref<2x32x96xbf16, #tpu.memory_space<vmem>>, vector<1x32x96xbf16>
    %195 = vector.shape_cast %194 : vector<1x32x96xbf16> to vector<32x96xbf16>
    %cst_65 = arith.constant dense<0.000000e+00> : vector<16x96xf32>
    %196 = tpu.matmul %192, %195, %cst_65 {dimension_numbers = #tpu.dot_dimension_numbers<[1], [0], [0], [1], [0, 0, 1, 1], [], []>} : vector<16x32xbf16>, vector<32x96xbf16>, vector<16x96xf32> -> vector<16x96xf32>
    %197 = arith.index_cast %c1_i32 : i32 to index
    %c0_66 = arith.constant 0 : index
    %c0_67 = arith.constant 0 : index
    %198 = vector.load %arg5[%197, %c0_66, %c0_67] : memref<2x1x96xf32, #tpu.memory_space<vmem>>, vector<1x1x96xf32>
    %199 = vector.shape_cast %198 : vector<1x1x96xf32> to vector<1x96xf32>
    %200 = vector.broadcast %199 : vector<1x96xf32> to vector<16x96xf32>
    %201 = arith.addf %196, %200 : vector<16x96xf32>
    %202 = vector.extract_strided_slice %201 {offsets = [0, 0], sizes = [16, 32], strides = [1, 1]} : vector<16x96xf32> to vector<16x32xf32>
    %203 = vector.shape_cast %202 : vector<16x32xf32> to vector<2x8x32xf32>
    %204 = vector.extract_strided_slice %201 {offsets = [0, 32], sizes = [16, 32], strides = [1, 1]} : vector<16x96xf32> to vector<16x32xf32>
    %205 = vector.shape_cast %204 : vector<16x32xf32> to vector<2x8x32xf32>
    %206 = vector.extract_strided_slice %201 {offsets = [0, 64], sizes = [16, 32], strides = [1, 1]} : vector<16x96xf32> to vector<16x32xf32>
    %207 = vector.shape_cast %206 : vector<16x32xf32> to vector<2x8x32xf32>
    %208 = vector.extract_strided_slice %203 {offsets = [0, 0, 0], sizes = [2, 8, 16], strides = [1, 1, 1]} : vector<2x8x32xf32> to vector<2x8x16xf32>
    %209 = arith.truncf %208 : vector<2x8x16xf32> to vector<2x8x16xbf16>
    %210 = vector.extract_strided_slice %205 {offsets = [0, 0, 0], sizes = [2, 8, 16], strides = [1, 1, 1]} : vector<2x8x32xf32> to vector<2x8x16xf32>
    %211 = arith.truncf %210 : vector<2x8x16xf32> to vector<2x8x16xbf16>
    %212 = vector.extract_strided_slice %207 {offsets = [0, 0, 0], sizes = [2, 8, 16], strides = [1, 1, 1]} : vector<2x8x32xf32> to vector<2x8x16xf32>
    %213 = arith.truncf %212 : vector<2x8x16xf32> to vector<2x8x16xbf16>
    %cst_68 = arith.constant dense<0.000000e+00> : vector<2x8x8xf32>
    %214 = tpu.matmul %209, %211, %cst_68 {dimension_numbers = #tpu.dot_dimension_numbers<[2], [2], [1], [1], [0, 0, 0, 1, 1, 1], [0], [0]>} : vector<2x8x16xbf16>, vector<2x8x16xbf16>, vector<2x8x8xf32> -> vector<2x8x8xf32>
    %215 = arith.addf %214, %7 : vector<2x8x8xf32>
    %cst_69 = arith.constant dense<0xFF800000> : vector<2x8xf32>
    %216 = vector.multi_reduction <maximumf>, %215, %cst_69 [2] : vector<2x8x8xf32> to vector<2x8xf32>
    %217 = vector.shape_cast %216 : vector<2x8xf32> to vector<2x8x1xf32>
    %218 = vector.broadcast %217 : vector<2x8x1xf32> to vector<2x8x8xf32>
    %219 = arith.subf %215, %218 : vector<2x8x8xf32>
    %220 = math.exp %219 : vector<2x8x8xf32>
    %cst_70 = arith.constant dense<0.000000e+00> : vector<2x8xf32>
    %221 = vector.multi_reduction <add>, %220, %cst_70 [2] : vector<2x8x8xf32> to vector<2x8xf32>
    %222 = vector.shape_cast %221 : vector<2x8xf32> to vector<2x8x1xf32>
    %223 = tpu.reciprocal %222 {approx = true} : vector<2x8x1xf32> -> vector<2x8x1xf32>
    %224 = vector.broadcast %223 : vector<2x8x1xf32> to vector<2x8x8xf32>
    %225 = arith.mulf %220, %224 : vector<2x8x8xf32>
    %226 = arith.truncf %225 : vector<2x8x8xf32> to vector<2x8x8xbf16>
    %cst_71 = arith.constant dense<0.000000e+00> : vector<2x8x16xf32>
    %227 = tpu.matmul %226, %213, %cst_71 {dimension_numbers = #tpu.dot_dimension_numbers<[2], [1], [1], [2], [0, 0, 0, 1, 1, 2], [0], [0]>} : vector<2x8x8xbf16>, vector<2x8x16xbf16>, vector<2x8x16xf32> -> vector<2x8x16xf32>
    %228 = vector.extract_strided_slice %203 {offsets = [0, 0, 16], sizes = [2, 8, 16], strides = [1, 1, 1]} : vector<2x8x32xf32> to vector<2x8x16xf32>
    %229 = arith.truncf %228 : vector<2x8x16xf32> to vector<2x8x16xbf16>
    %230 = vector.extract_strided_slice %205 {offsets = [0, 0, 16], sizes = [2, 8, 16], strides = [1, 1, 1]} : vector<2x8x32xf32> to vector<2x8x16xf32>
    %231 = arith.truncf %230 : vector<2x8x16xf32> to vector<2x8x16xbf16>
    %232 = vector.extract_strided_slice %207 {offsets = [0, 0, 16], sizes = [2, 8, 16], strides = [1, 1, 1]} : vector<2x8x32xf32> to vector<2x8x16xf32>
    %233 = arith.truncf %232 : vector<2x8x16xf32> to vector<2x8x16xbf16>
    %cst_72 = arith.constant dense<0.000000e+00> : vector<2x8x8xf32>
    %234 = tpu.matmul %229, %231, %cst_72 {dimension_numbers = #tpu.dot_dimension_numbers<[2], [2], [1], [1], [0, 0, 0, 1, 1, 1], [0], [0]>} : vector<2x8x16xbf16>, vector<2x8x16xbf16>, vector<2x8x8xf32> -> vector<2x8x8xf32>
    %235 = arith.addf %234, %7 : vector<2x8x8xf32>
    %cst_73 = arith.constant dense<0xFF800000> : vector<2x8xf32>
    %236 = vector.multi_reduction <maximumf>, %235, %cst_73 [2] : vector<2x8x8xf32> to vector<2x8xf32>
    %237 = vector.shape_cast %236 : vector<2x8xf32> to vector<2x8x1xf32>
    %238 = vector.broadcast %237 : vector<2x8x1xf32> to vector<2x8x8xf32>
    %239 = arith.subf %235, %238 : vector<2x8x8xf32>
    %240 = math.exp %239 : vector<2x8x8xf32>
    %cst_74 = arith.constant dense<0.000000e+00> : vector<2x8xf32>
    %241 = vector.multi_reduction <add>, %240, %cst_74 [2] : vector<2x8x8xf32> to vector<2x8xf32>
    %242 = vector.shape_cast %241 : vector<2x8xf32> to vector<2x8x1xf32>
    %243 = tpu.reciprocal %242 {approx = true} : vector<2x8x1xf32> -> vector<2x8x1xf32>
    %244 = vector.broadcast %243 : vector<2x8x1xf32> to vector<2x8x8xf32>
    %245 = arith.mulf %240, %244 : vector<2x8x8xf32>
    %246 = arith.truncf %245 : vector<2x8x8xf32> to vector<2x8x8xbf16>
    %cst_75 = arith.constant dense<0.000000e+00> : vector<2x8x16xf32>
    %247 = tpu.matmul %246, %233, %cst_75 {dimension_numbers = #tpu.dot_dimension_numbers<[2], [1], [1], [2], [0, 0, 0, 1, 1, 2], [0], [0]>} : vector<2x8x8xbf16>, vector<2x8x16xbf16>, vector<2x8x16xf32> -> vector<2x8x16xf32>
    %248 = tpu.concatenate %227, %247 in 2 : vector<2x8x16xf32>, vector<2x8x16xf32> -> vector<2x8x32xf32>
    %249 = vector.shape_cast %248 : vector<2x8x32xf32> to vector<16x32xf32>
    %250 = arith.truncf %249 : vector<16x32xf32> to vector<16x32xbf16>
    %251 = arith.index_cast %c1_i32 : i32 to index
    %c0_76 = arith.constant 0 : index
    %c0_77 = arith.constant 0 : index
    %252 = vector.load %arg6[%251, %c0_76, %c0_77] : memref<2x32x32xbf16, #tpu.memory_space<vmem>>, vector<1x32x32xbf16>
    %253 = vector.shape_cast %252 : vector<1x32x32xbf16> to vector<32x32xbf16>
    %cst_78 = arith.constant dense<0.000000e+00> : vector<16x32xf32>
    %254 = tpu.matmul %250, %253, %cst_78 {dimension_numbers = #tpu.dot_dimension_numbers<[1], [0], [0], [1], [0, 0, 1, 1], [], []>} : vector<16x32xbf16>, vector<32x32xbf16>, vector<16x32xf32> -> vector<16x32xf32>
    %255 = arith.index_cast %c1_i32 : i32 to index
    %c0_79 = arith.constant 0 : index
    %c0_80 = arith.constant 0 : index
    %256 = vector.load %arg7[%255, %c0_79, %c0_80] : memref<2x1x32xf32, #tpu.memory_space<vmem>>, vector<1x1x32xf32>
    %257 = vector.shape_cast %256 : vector<1x1x32xf32> to vector<1x32xf32>
    %258 = vector.broadcast %257 : vector<1x32xf32> to vector<16x32xf32>
    %259 = arith.addf %254, %258 : vector<16x32xf32>
    %260 = arith.addf %191, %259 : vector<16x32xf32>
    %261 = arith.index_cast %c1_i32 : i32 to index
    %c0_81 = arith.constant 0 : index
    %c0_82 = arith.constant 0 : index
    %262 = vector.load %arg8[%261, %c0_81, %c0_82] : memref<2x1x32xf32, #tpu.memory_space<vmem>>, vector<1x1x32xf32>
    %263 = vector.shape_cast %262 : vector<1x1x32xf32> to vector<1x32xf32>
    %264 = arith.index_cast %c1_i32 : i32 to index
    %c0_83 = arith.constant 0 : index
    %c0_84 = arith.constant 0 : index
    %265 = vector.load %arg9[%264, %c0_83, %c0_84] : memref<2x1x32xf32, #tpu.memory_space<vmem>>, vector<1x1x32xf32>
    %266 = vector.shape_cast %265 : vector<1x1x32xf32> to vector<1x32xf32>
    %cst_85 = arith.constant dense<0.000000e+00> : vector<16xf32>
    %267 = vector.multi_reduction <add>, %260, %cst_85 [1] : vector<16x32xf32> to vector<16xf32>
    %268 = vector.shape_cast %267 : vector<16xf32> to vector<16x1xf32>
    %cst_86 = arith.constant 3.200000e+01 : f32
    %269 = vector.broadcast %cst_86 : f32 to vector<16x1xf32>
    %270 = arith.divf %268, %269 : vector<16x1xf32>
    %271 = vector.broadcast %270 : vector<16x1xf32> to vector<16x32xf32>
    %272 = arith.subf %260, %271 : vector<16x32xf32>
    %273 = arith.mulf %272, %272 : vector<16x32xf32>
    %cst_87 = arith.constant dense<0.000000e+00> : vector<16xf32>
    %274 = vector.multi_reduction <add>, %273, %cst_87 [1] : vector<16x32xf32> to vector<16xf32>
    %275 = vector.shape_cast %274 : vector<16xf32> to vector<16x1xf32>
    %cst_88 = arith.constant 3.200000e+01 : f32
    %276 = vector.broadcast %cst_88 : f32 to vector<16x1xf32>
    %277 = arith.divf %275, %276 : vector<16x1xf32>
    %278 = vector.broadcast %270 : vector<16x1xf32> to vector<16x32xf32>
    %279 = arith.subf %260, %278 : vector<16x32xf32>
    %cst_89 = arith.constant 9.99999996E-13 : f32
    %280 = vector.broadcast %cst_89 : f32 to vector<16x1xf32>
    %281 = arith.addf %277, %280 : vector<16x1xf32>
    %282 = math.rsqrt %281 : vector<16x1xf32>
    %283 = vector.broadcast %282 : vector<16x1xf32> to vector<16x32xf32>
    %284 = arith.mulf %279, %283 : vector<16x32xf32>
    %285 = vector.broadcast %263 : vector<1x32xf32> to vector<16x32xf32>
    %286 = arith.mulf %284, %285 : vector<16x32xf32>
    %287 = vector.broadcast %266 : vector<1x32xf32> to vector<16x32xf32>
    %288 = arith.addf %286, %287 : vector<16x32xf32>
    %289 = arith.truncf %288 : vector<16x32xf32> to vector<16x32xbf16>
    %290 = arith.index_cast %c1_i32 : i32 to index
    %c0_90 = arith.constant 0 : index
    %c0_91 = arith.constant 0 : index
    %291 = vector.load %arg10[%290, %c0_90, %c0_91] : memref<2x32x64xbf16, #tpu.memory_space<vmem>>, vector<1x32x64xbf16>
    %292 = vector.shape_cast %291 : vector<1x32x64xbf16> to vector<32x64xbf16>
    %cst_92 = arith.constant dense<0.000000e+00> : vector<16x64xf32>
    %293 = tpu.matmul %289, %292, %cst_92 {dimension_numbers = #tpu.dot_dimension_numbers<[1], [0], [0], [1], [0, 0, 1, 1], [], []>} : vector<16x32xbf16>, vector<32x64xbf16>, vector<16x64xf32> -> vector<16x64xf32>
    %294 = arith.index_cast %c1_i32 : i32 to index
    %c0_93 = arith.constant 0 : index
    %c0_94 = arith.constant 0 : index
    %295 = vector.load %arg11[%294, %c0_93, %c0_94] : memref<2x1x64xf32, #tpu.memory_space<vmem>>, vector<1x1x64xf32>
    %296 = vector.shape_cast %295 : vector<1x1x64xf32> to vector<1x64xf32>
    %297 = vector.broadcast %296 : vector<1x64xf32> to vector<16x64xf32>
    %298 = arith.addf %293, %297 : vector<16x64xf32>
    %cst_95 = arith.constant 5.000000e-01 : f32
    %299 = vector.broadcast %cst_95 : f32 to vector<16x64xf32>
    %300 = arith.mulf %299, %298 : vector<16x64xf32>
    %cst_96 = arith.constant 4.471500e-02 : f32
    %301 = vector.broadcast %cst_96 : f32 to vector<16x64xf32>
    %302 = arith.mulf %301, %298 : vector<16x64xf32>
    %303 = arith.mulf %302, %298 : vector<16x64xf32>
    %304 = arith.mulf %303, %298 : vector<16x64xf32>
    %305 = arith.addf %298, %304 : vector<16x64xf32>
    %cst_97 = arith.constant 0.797884583 : f32
    %306 = vector.broadcast %cst_97 : f32 to vector<16x64xf32>
    %307 = arith.mulf %306, %305 : vector<16x64xf32>
    %308 = math.tanh %307 : vector<16x64xf32>
    %cst_98 = arith.constant 1.000000e+00 : f32
    %309 = vector.broadcast %cst_98 : f32 to vector<16x64xf32>
    %310 = arith.addf %309, %308 : vector<16x64xf32>
    %311 = arith.mulf %300, %310 : vector<16x64xf32>
    %312 = arith.truncf %311 : vector<16x64xf32> to vector<16x64xbf16>
    %313 = arith.index_cast %c1_i32 : i32 to index
    %c0_99 = arith.constant 0 : index
    %c0_100 = arith.constant 0 : index
    %314 = vector.load %arg12[%313, %c0_99, %c0_100] : memref<2x64x32xbf16, #tpu.memory_space<vmem>>, vector<1x64x32xbf16>
    %315 = vector.shape_cast %314 : vector<1x64x32xbf16> to vector<64x32xbf16>
    %cst_101 = arith.constant dense<0.000000e+00> : vector<16x32xf32>
    %316 = tpu.matmul %312, %315, %cst_101 {dimension_numbers = #tpu.dot_dimension_numbers<[1], [0], [0], [1], [0, 0, 1, 1], [], []>} : vector<16x64xbf16>, vector<64x32xbf16>, vector<16x32xf32> -> vector<16x32xf32>
    %317 = arith.index_cast %c1_i32 : i32 to index
    %c0_102 = arith.constant 0 : index
    %c0_103 = arith.constant 0 : index
    %318 = vector.load %arg13[%317, %c0_102, %c0_103] : memref<2x1x32xf32, #tpu.memory_space<vmem>>, vector<1x1x32xf32>
    %319 = vector.shape_cast %318 : vector<1x1x32xf32> to vector<1x32xf32>
    %320 = vector.broadcast %319 : vector<1x32xf32> to vector<16x32xf32>
    %321 = arith.addf %316, %320 : vector<16x32xf32>
    %322 = arith.addf %288, %321 : vector<16x32xf32>
    %323 = arith.index_cast %c1_i32 : i32 to index
    %c0_104 = arith.constant 0 : index
    %c0_105 = arith.constant 0 : index
    %324 = vector.load %arg14[%323, %c0_104, %c0_105] : memref<2x1x32xf32, #tpu.memory_space<vmem>>, vector<1x1x32xf32>
    %325 = vector.shape_cast %324 : vector<1x1x32xf32> to vector<1x32xf32>
    %326 = arith.index_cast %c1_i32 : i32 to index
    %c0_106 = arith.constant 0 : index
    %c0_107 = arith.constant 0 : index
    %327 = vector.load %arg15[%326, %c0_106, %c0_107] : memref<2x1x32xf32, #tpu.memory_space<vmem>>, vector<1x1x32xf32>
    %328 = vector.shape_cast %327 : vector<1x1x32xf32> to vector<1x32xf32>
    %cst_108 = arith.constant dense<0.000000e+00> : vector<16xf32>
    %329 = vector.multi_reduction <add>, %322, %cst_108 [1] : vector<16x32xf32> to vector<16xf32>
    %330 = vector.shape_cast %329 : vector<16xf32> to vector<16x1xf32>
    %cst_109 = arith.constant 3.200000e+01 : f32
    %331 = vector.broadcast %cst_109 : f32 to vector<16x1xf32>
    %332 = arith.divf %330, %331 : vector<16x1xf32>
    %333 = vector.broadcast %332 : vector<16x1xf32> to vector<16x32xf32>
    %334 = arith.subf %322, %333 : vector<16x32xf32>
    %335 = arith.mulf %334, %334 : vector<16x32xf32>
    %cst_110 = arith.constant dense<0.000000e+00> : vector<16xf32>
    %336 = vector.multi_reduction <add>, %335, %cst_110 [1] : vector<16x32xf32> to vector<16xf32>
    %337 = vector.shape_cast %336 : vector<16xf32> to vector<16x1xf32>
    %cst_111 = arith.constant 3.200000e+01 : f32
    %338 = vector.broadcast %cst_111 : f32 to vector<16x1xf32>
    %339 = arith.divf %337, %338 : vector<16x1xf32>
    %340 = vector.broadcast %332 : vector<16x1xf32> to vector<16x32xf32>
    %341 = arith.subf %322, %340 : vector<16x32xf32>
    %cst_112 = arith.constant 9.99999996E-13 : f32
    %342 = vector.broadcast %cst_112 : f32 to vector<16x1xf32>
    %343 = arith.addf %339, %342 : vector<16x1xf32>
    %344 = math.rsqrt %343 : vector<16x1xf32>
    %345 = vector.broadcast %344 : vector<16x1xf32> to vector<16x32xf32>
    %346 = arith.mulf %341, %345 : vector<16x32xf32>
    %347 = vector.broadcast %325 : vector<1x32xf32> to vector<16x32xf32>
    %348 = arith.mulf %346, %347 : vector<16x32xf32>
    %349 = vector.broadcast %328 : vector<1x32xf32> to vector<16x32xf32>
    %350 = arith.addf %348, %349 : vector<16x32xf32>
    %c2_i32 = arith.constant 2 : i32
    %351 = vector.shape_cast %350 : vector<16x32xf32> to vector<2x8x32xf32>
    %352 = vector.shape_cast %0 : vector<2x8xf32> to vector<2x8x1xf32>
    %353 = vector.broadcast %352 : vector<2x8x1xf32> to vector<2x8x32xf32>
    %354 = arith.mulf %351, %353 : vector<2x8x32xf32>
    %cst_113 = arith.constant dense<0.000000e+00> : vector<2x32xf32>
    %355 = vector.multi_reduction <add>, %354, %cst_113 [1] : vector<2x8x32xf32> to vector<2x32xf32>
    %cst_114 = arith.constant dense<0.000000e+00> : vector<2xf32>
    %356 = vector.multi_reduction <add>, %0, %cst_114 [1] : vector<2x8xf32> to vector<2xf32>
    %357 = vector.shape_cast %356 : vector<2xf32> to vector<2x1xf32>
    %cst_115 = arith.constant 9.99999971E-10 : f32
    %358 = vector.broadcast %cst_115 : f32 to vector<2x1xf32>
    %359 = arith.maximumf %357, %358 : vector<2x1xf32>
    %360 = tpu.reciprocal %359 {approx = true} : vector<2x1xf32> -> vector<2x1xf32>
    %361 = vector.broadcast %360 : vector<2x1xf32> to vector<2x32xf32>
    %362 = arith.mulf %355, %361 : vector<2x32xf32>
    %c0_116 = arith.constant 0 : index
    %c0_117 = arith.constant 0 : index
    %363 = vector.load %arg16[%c0_116, %c0_117] : memref<2x32xf32, #tpu.memory_space<vmem>>, vector<2x32xf32>
    tpu.vector_store %arg16[%c0_116, %c0_117], %362 {strides = array<i32>} : memref<2x32xf32, #tpu.memory_space<vmem>>, vector<2x32xf32>,
    return
  }
}

</mosaic_0001>

<bundles_post_ra>
// kernel: sentence_transformer_forward.1
= control target key start
LH: loop header
LB: loop body
LE: loop exit
PB: predicated region body
PF: predicated region fallthrough
CT: control target
= control target key end

     0   :  { %s1977_s0 = inlined_call_operand.vmem [shape: f32[16,32], index: 0, kind: input, shape index: {}]   ;;  %s1978_s1 = inlined_call_operand.vmem [shape: f32[2,8], index: 1, kind: input, shape index: {}]   ;;  %s1979_s2 = inlined_call_operand.vmem [shape: f32[1,32], index: 2, kind: input, shape index: {}]   ;;  %s1980_s3 = inlined_call_operand.vmem [shape: f32[1,32], index: 3, kind: input, shape index: {}]   ;;  %s1981_s4 = inlined_call_operand.vmem [shape: bf16[2,32,96], index: 4, kind: input, shape index: {}]   ;;  %s1982_s5 = inlined_call_operand.vmem [shape: f32[2,1,96], index: 5, kind: input, shape index: {}]   ;;  %s1983_s6 = inlined_call_operand.vmem [shape: bf16[2,32,32], index: 6, kind: input, shape index: {}]   ;;  %s1984_s7 = inlined_call_operand.vmem [shape: f32[2,1,32], index: 7, kind: input, shape index: {}]   ;;  %s1985_s8 = inlined_call_operand.vmem [shape: f32[2,1,32], index: 8, kind: input, shape index: {}]   ;;  %s1986_s9 = inlined_call_operand.vmem [shape: f32[2,1,32], index: 9, kind: input, shape index: {}]   ;;  %s1987_s10 = inlined_call_operand.vmem [shape: bf16[2,32,64], index: 10, kind: input, shape index: {}]   ;;  %s1988_s11 = inlined_call_operand.vmem [shape: f32[2,1,64], index: 11, kind: input, shape index: {}]   ;;  %s1989_s12 = inlined_call_operand.vmem [shape: bf16[2,64,32], index: 12, kind: input, shape index: {}]   ;;  %s1990_s13 = inlined_call_operand.vmem [shape: f32[2,1,32], index: 13, kind: input, shape index: {}]   ;;  %s1991_s14 = inlined_call_operand.vmem [shape: f32[2,1,32], index: 14, kind: input, shape index: {}]   ;;  %s1992_s15 = inlined_call_operand.vmem [shape: f32[2,1,32], index: 15, kind: input, shape index: {}]   ;;  %s1993_s16 = inlined_call_operand.hbm [shape: f32[2,32], index: 16, kind: output, shape index: {}]  }
   0x1   :  { %1995 = sst [smem:[#allocation5_spill]] %s1977_s0 }
   0x2   :  { %s1996_s23 = sld [smem:[#allocation5_spill]]  ;;  %vm68_vm0 = vcmask 261120  }
   0x8   :  { %v64_v0 = vld [vmem:[%s1996_s23] sm:$0xff]  ;;  %v65_v2 = vld [vmem:[%s1996_s23 + $0x8] sm:$0xff] }
   0x9   :  { %v69_v1 = vsel %vm68_vm0, %v64_v0, 0.0  ;;  %v72_v3 = vsel %vm68_vm0, %v65_v2, 0.0 }
   0xa   :  { %70 = vadd.xlane.f32.xlu0 %v69_v1 }
   0xb   :  { %21 = vsyncpa [#allocation3], 0  ;;  %v1573_v4 = vmov 32.0   ;;  %v1425_v21 = vld [vmem:[%s1981_s4 + $0x8] sm:$0xff]  ;;  %v1424_v23 = vld [vmem:[%s1981_s4] sm:$0xff]  ;;  %s1575_s20 = smov 96  }
   0xc   :  { %1482 = vrcp.f32 %v1573_v4  ;;  %160 = vmatpush.bf16.msra.mxu0 %v1425_v21  ;;  %v1464_v42 = vld [vmem:[%s1979_s2] ss:$0 sm:$0xff]  ;;  %s1576_s21 = smov 112   ;;  %vm175_vm8 = vcmask 130048   ;;  %vm219_vm9 = vcmask 64512   ;;  %s1577_s24 = smov 64  }
   0xd   :  { %v1465_v47 = vld [vmem:[%s1980_s3] ss:$0 sm:$0xff]  ;;  %s1574_s3 = smov 80   ;;  %s1578_s25 = smov 48   ;;  %vm249_vm10 = vcmask 1043456  }
   0xe   :  { %v1466_v52 = vld [vmem:[%s1982_s5] ss:$0 sm:$0xff]  ;;  %s1579_s28 = smov 16  }
  0x10   :  { %161 = vmatpush.bf16.msra.mxu0 %v1424_v23 }
  0x12   :  { %73 = vadd.xlane.f32.xlu0 %v72_v3  ;;  %v1483_v5 = vpop.eup %1482 }
  0x13   :  { %v76_v6 = vmul.f32 32.0, %v1483_v5  ;;  %vm80_vm1 = vweird.f32 %v1483_v5 }
  0x15   :  { %v77_v7 = vsub.f32 1.0, %v76_v6 }
  0x17   :  { %v78_v8 = vmul.f32 %v1483_v5, %v77_v7 }
  0x19   :  { %v79_v9 = vadd.f32 %v1483_v5, %v78_v8 }
  0x1b   :  { %v1674_v10 = vsel %vm80_vm1, %v1483_v5, %v79_v9  ;;  %v55_v9 = vld [vmem:[%s1978_s1] sm:$0x3] }
  0x7d   :  { %v71_v11 = vpop.xlane.xlu0 %70 }
  0x7e   :  { %v82_v12 = vmul.f32 %v1674_v10, %v71_v11  ;;  %v56_v11 = vsub.f32 1.0, %v55_v9 }
  0x80   :  { %v84_v13 = vsub.f32 %v64_v0, %v82_v12  ;;  %v57_v12 = vmul.f32 -1e+09, %v56_v11 }
  0x82   :  { %v86_v14 = vmul.f32 %v84_v13, %v84_v13 }
  0x84   :  { %v88_v15 = vsel %vm68_vm0, %v86_v14, 0.0 }
  0x85   :  { %89 = vadd.xlane.f32.xlu1 %v88_v15  ;;  %v74_v16 = vpop.xlane.xlu0 %73 }
  0x86   :  { %v83_v17 = vmul.f32 %v1674_v10, %v74_v16 }
  0x88   :  { %v85_v18 = vsub.f32 %v65_v2, %v83_v17  ;;  %v59_v17 = vrot.slane %v57_v12, 1 }
  0x8a   :  { %v87_v19 = vmul.f32 %v85_v18, %v85_v18 }
  0x8c   :  { %v91_v20 = vsel %vm68_vm0, %v87_v19, 0.0  ;;  %v1735_v19 = vperm.slane %v59_v17, 0 }
  0x8d   :  { %92 = vadd.xlane.f32.xlu1 %v91_v20 }
  0xf8   :  { %v90_v22 = vpop.xlane.xlu1 %89 }
  0xf9   :  { %v94_v24 = vmul.f32 %v90_v22, %v1674_v10 }
  0xfb   :  { %v96_v25 = vadd.f32 1e-12, %v94_v24 }
  0xfd   :  { %1484 = vrsqrt.f32 %v96_v25  ;;  %vm104_vm3 = vweird.f32 %v96_v25 }
 0x100   :  { %v93_v26 = vpop.xlane.xlu1 %92 }
 0x101   :  { %v95_v27 = vmul.f32 %v93_v26, %v1674_v10 }
 0x103   :  { %v1485_v28 = vpop.eup %1484  ;;  %v97_v29 = vadd.f32 1e-12, %v95_v27 }
 0x104   :  { %v99_v30 = vmul.f32 %v1485_v28, %v96_v25  ;;  %vm105_vm2 = vweird.f32 %v1485_v28 }
 0x105   :  { %1486 = vrsqrt.f32 %v97_v29  ;;  %vm106_vm4 = vmor %vm104_vm3, %vm105_vm2  ;;  %vm114_vm6 = vweird.f32 %v97_v29  ;;  %vm598_vm2 = vcmask 523264  }
 0x106   :  { %v100_v31 = vmul.f32 %v1485_v28, %v99_v30 }
 0x108   :  { %v101_v32 = vmul.f32 0.5, %v100_v31 }
 0x10a   :  { %v102_v33 = vsub.f32 1.5, %v101_v32 }
 0x10b   :  { %v1487_v34 = vpop.eup %1486 }
 0x10c   :  { %v103_v35 = vmul.f32 %v1485_v28, %v102_v33  ;;  %v109_v36 = vmul.f32 %v1487_v34, %v97_v29  ;;  %vm115_vm5 = vweird.f32 %v1487_v34 }
 0x10d   :  { %vm116_vm7 = vmor %vm114_vm6, %vm115_vm5 }
 0x10e   :  { %v110_v37 = vmul.f32 %v1487_v34, %v109_v36  ;;  %v107_v38 = vsel %vm106_vm4, %v1485_v28, %v103_v35 }
 0x10f   :  { %v118_v41 = vmul.f32 %v107_v38, %v84_v13  ;;  %v1731_v13 = vperm.slane %v57_v12, 0 }
 0x110   :  { %v111_v39 = vmul.f32 0.5, %v110_v37 }
 0x111   :  { %v123_v46 = vmul.f32 %v1464_v42, %v118_v41 }
 0x112   :  { %v112_v40 = vsub.f32 1.5, %v111_v39 }
 0x113   :  { %v1694_v49 = vadd.f32 %v1465_v47, %v123_v46 }
 0x114   :  { %v113_v43 = vmul.f32 %v1487_v34, %v112_v40 }
 0x116   :  { %v117_v44 = vsel %vm116_vm7, %v1487_v34, %v113_v43 }
 0x117   :  { %v119_v45 = vmul.f32 %v117_v44, %v85_v18 }
 0x119   :  { %v124_v48 = vmul.f32 %v1464_v42, %v119_v45 }
 0x11b   :  { %v1696_v50 = vadd.f32 %v1465_v47, %v124_v48 }
 0x11d   :  { %v130_v51 = vpack.c.bf16 %v1696_v50, %v1694_v49 }
 0x11f   :  { %1300 = vmatmul.msk.bf16.vlgmr.msra.gmra.mxu0 %vm68_vm0, %v130_v51 }
 0x19c   :  { %v163_v53 = vpop.f32.mrf.mxu0 }
 0x19d   :  { %v164_v54 = vadd.f32 %v1466_v52, %v163_v53 }
 0x19f   :  { %v168_v55 = vpack.c.bf16 %v164_v54, %v164_v54 }
 0x1a1   :  { %v171_v56 = vunpack.c.l.b16 %v168_v55 }
 0x1a3   :  { %v1704_v57 = vpack.c.b16 %v171_v56, %v171_v56 }
 0x1a4   :  { %v165_v58 = vpop.f32.mrf.mxu0 }
 0x1a5   :  { %v166_v59 = vadd.f32 %v1466_v52, %v165_v58  ;;  %289 = vrot.lane.b32.xlu0 %v1704_v57, %s1574_s3  ;;  %173 = vrot.lane.b32.xlu2 %v1704_v57, %s1575_s20 }
 0x1a7   :  { %v169_v60 = vpack.c.bf16 %v166_v59, %v166_v59 }
 0x1a9   :  { %v196_v61 = vunpack.c.l.b16 %v169_v60 }
 0x1ab   :  { %v1710_v62 = vpack.c.b16 %v196_v61, %v196_v61 }
 0x1ad   :  { %312 = vrot.lane.b32.xlu1 %v1710_v62, %s1574_s3  ;;  %198 = vrot.lane.b32.xlu2 %v1710_v62, %s1575_s20 }
 0x1b5   :  { %287 = vrot.lane.b32.xlu2 %v1704_v57, %s1576_s21 }
 0x1bd   :  { %310 = vrot.lane.b32.xlu2 %v1710_v62, %s1576_s21 }
 0x1ff   :  { %v174_v63 = vpop.permute.xlu2 %173 }
 0x200   :  { %v180_v0 = vsel %vm175_vm8, %v174_v63, 0 }
 0x201   :  { %189 = vmatpush.bf16.xpose.msra.mxu1 %v180_v0 }
 0x207   :  { %v199_v1 = vpop.permute.xlu2 %198 }
 0x208   :  { %1301 = vmatmul.msk.bf16.vlgmr.msra.gmra.mxu1 %vm175_vm8, %v168_v55  ;;  %v204_v2 = vsel %vm175_vm8, %v199_v1, 0 }
 0x209   :  { %213 = vmatpush.bf16.xpose.msra.mxu2 %v204_v2 }
 0x20f   :  { %v288_v5 = vpop.permute.xlu2 %287 }
 0x210   :  { %1302 = vmatmul.msk.bf16.vlgmr.msra.gmra.mxu2 %vm175_vm8, %v169_v60 }
 0x217   :  { %v290_v3 = vpop.permute.xlu0 %289  ;;  %v311_v8 = vpop.permute.xlu2 %310 }
 0x218   :  { %v295_v4 = vsel %vm175_vm8, %v290_v3, 0 }
 0x219   :  { %304 = vmatpush.bf16.xpose.msrb.mxu0 %v295_v4 }
 0x21f   :  { %v313_v6 = vpop.permute.xlu1 %312 }
 0x220   :  { %1305 = vmatmul.msk.bf16.vlgmr.msrb.gmra.mxu0 %vm175_vm8, %v288_v5  ;;  %v318_v7 = vsel %vm175_vm8, %v313_v6, 0 }
 0x221   :  { %327 = vmatpush.bf16.xpose.msrb.mxu1 %v318_v7 }
 0x228   :  { %1306 = vmatmul.msk.bf16.vlgmr.msrb.gmra.mxu1 %vm175_vm8, %v311_v8 }
 0x285   :  { %v191_v14 = vpop.f32.mrf.mxu1 }
 0x286   :  { %v192_v15 = vadd.f32 %v191_v14, %v1731_v13 }
 0x288   :  { %v220_v16 = vsel %vm219_vm9, %v192_v15, -inf }
 0x289   :  { %221 = vmax.xlane.f32.xlu2 %v220_v16 }
 0x28d   :  { %v193_v18 = vpop.f32.mrf.mxu1 }
 0x28e   :  { %v1427_v18 = vld [vmem:[%s1983_s6 + $0x8] sm:$0xff] }
 0x28f   :  { %439 = vmatpush.bf16.msra.mxu0 %v1427_v18 }
 0x293   :  { %v215_v20 = vpop.f32.mrf.mxu2 }
 0x294   :  { %v216_v21 = vadd.f32 %v215_v20, %v1735_v19 }
 0x296   :  { %v223_v22 = vsel %vm219_vm9, %v216_v21, -inf }
 0x297   :  { %224 = vmax.xlane.f32.xlu0 %v223_v22 }
 0x29b   :  { %v217_v23 = vpop.f32.mrf.mxu2 }
 0x29d   :  { %v306_v24 = vpop.f32.mrf.mxu0 }
 0x29e   :  { %v307_v25 = vadd.f32 %v306_v24, %v1731_v13 }
 0x2a0   :  { %v333_v26 = vsel %vm219_vm9, %v307_v25, -inf }
 0x2a1   :  { %334 = vmax.xlane.f32.xlu1 %v333_v26 }
 0x2a5   :  { %v308_v27 = vpop.f32.mrf.mxu0  ;;  %v329_v28 = vpop.f32.mrf.mxu1 }
 0x2a6   :  { %v330_v29 = vadd.f32 %v329_v28, %v1735_v19  ;;  %v1426_v27 = vld [vmem:[%s1983_s6] sm:$0xff] }
 0x2a7   :  { %440 = vmatpush.bf16.msra.mxu0 %v1426_v27  ;;  %v1470_v27 = vld [vmem:[%s1988_s11] ss:$0 sm:$0xff] }
 0x2a8   :  { %v336_v30 = vsel %vm219_vm9, %v330_v29, -inf }
 0x2a9   :  { %337 = vmax.xlane.f32.xlu2 %v336_v30 }
 0x2ab   :  { %266 = vrot.lane.b32.xlu0 %v1710_v62, %s1577_s24 }
 0x2ad   :  { %v331_v31 = vpop.f32.mrf.mxu1 }
 0x2c1   :  { %244 = vrot.lane.b32.xlu2 %v1704_v57, %s1577_s24 }
 0x2c9   :  { %357 = vrot.lane.b32.xlu2 %v1704_v57, %s1578_s25 }
 0x2fc   :  { %v222_v32 = vpop.xlane.xlu2 %221 }
 0x2fd   :  { %v226_v33 = vsub.f32 %v192_v15, %v222_v32 }
 0x2ff   :  { %v228_v34 = vmul.f32 1.442695, %v226_v33 }
 0x301   :  { %1488 = vpow2.f32 %v228_v34  ;;  %v1467_v34 = vld [vmem:[%s1984_s7] ss:$0 sm:$0xff] }
 0x307   :  { %v1489_v35 = vpop.eup %1488 }
 0x308   :  { %v232_v36 = vsel %vm219_vm9, %v1489_v35, 0.0 }
 0x309   :  { %233 = vadd.xlane.f32.xlu0 %v232_v36 }
 0x30a   :  { %v225_v37 = vpop.xlane.xlu0 %224 }
 0x30b   :  { %v227_v38 = vsub.f32 %v216_v21, %v225_v37 }
 0x30d   :  { %v230_v39 = vmul.f32 1.442695, %v227_v38 }
 0x30f   :  { %1490 = vpow2.f32 %v230_v39 }
 0x314   :  { %v335_v40 = vpop.xlane.xlu1 %334 }
 0x315   :  { %v1491_v41 = vpop.eup %1490  ;;  %v339_v42 = vsub.f32 %v307_v25, %v335_v40 }
 0x316   :  { %v235_v43 = vsel %vm219_vm9, %v1491_v41, 0.0 }
 0x317   :  { %v341_v44 = vmul.f32 1.442695, %v339_v42  ;;  %236 = vadd.xlane.f32.xlu1 %v235_v43 }
 0x319   :  { %1492 = vpow2.f32 %v341_v44 }
 0x31c   :  { %v338_v45 = vpop.xlane.xlu2 %337 }
 0x31d   :  { %v340_v46 = vsub.f32 %v330_v29, %v338_v45  ;;  %378 = vrot.lane.b32.xlu0 %v1710_v62, %s1578_s25  ;;  %v267_v52 = vpop.permute.xlu0 %266 }
 0x31e   :  { %v272_v55 = vsel %vm249_vm10, %v267_v52, 0 }
 0x31f   :  { %v1493_v47 = vpop.eup %1492  ;;  %v343_v48 = vmul.f32 1.442695, %v340_v46 }
 0x320   :  { %v345_v51 = vsel %vm219_vm9, %v1493_v47, 0.0 }
 0x321   :  { %1494 = vpow2.f32 %v343_v48  ;;  %346 = vadd.xlane.f32.xlu1 %v345_v51 }
 0x324   :  { %v245_v53 = vpop.permute.xlu2 %244 }
 0x325   :  { %v251_v54 = vsel %vm249_vm10, %v245_v53, 0 }
 0x326   :  { %260 = vmatpush.bf16.msra.mxu3 %v251_v54 }
 0x327   :  { %v1495_v56 = vpop.eup %1494 }
 0x328   :  { %v348_v57 = vsel %vm219_vm9, %v1495_v56, 0.0 }
 0x329   :  { %349 = vadd.xlane.f32.xlu1 %v348_v57 }
 0x32a   :  { %281 = vmatpush.bf16.msrb.mxu3 %v272_v55 }
 0x32c   :  { %v358_v58 = vpop.permute.xlu2 %357 }
 0x32d   :  { %v363_v59 = vsel %vm249_vm10, %v358_v58, 0 }
 0x32e   :  { %372 = vmatpush.bf16.msrb.mxu2 %v363_v59 }
 0x37c   :  { %v234_v60 = vpop.xlane.xlu0 %233 }
 0x37d   :  { %1496 = vrcp.f32 %v234_v60 }
 0x383   :  { %v1497_v61 = vpop.eup %1496 }
 0x384   :  { %v240_v62 = vmul.f32 %v1497_v61, %v1489_v35 }
 0x386   :  { %v242_v63 = vpack.c.bf16 %v240_v62, %v240_v62 }
 0x388   :  { %1303 = vmatmul.msk.bf16.vlgmr.msra.gmra.mxu3 %vm219_vm9, %v242_v63 }
 0x38a   :  { %v237_v0 = vpop.xlane.xlu1 %236 }
 0x38b   :  { %1498 = vrcp.f32 %v237_v0 }
 0x38f   :  { %v379_v1 = vpop.permute.xlu0 %378 }
 0x390   :  { %v384_v2 = vsel %vm249_vm10, %v379_v1, 0 }
 0x391   :  { %v1499_v3 = vpop.eup %1498  ;;  %393 = vmatpush.bf16.msra.mxu3 %v384_v2 }
 0x392   :  { %v241_v4 = vmul.f32 %v1499_v3, %v1491_v41 }
 0x394   :  { %v347_v5 = vpop.xlane.xlu1 %346  ;;  %v243_v6 = vpack.c.bf16 %v241_v4, %v241_v4 }
 0x395   :  { %1500 = vrcp.f32 %v347_v5 }
 0x398   :  { %1304 = vmatmul.msk.bf16.vlgmr.msrb.gmra.mxu3 %vm219_vm9, %v243_v6 }
 0x39b   :  { %v1501_v7 = vpop.eup %1500 }
 0x39c   :  { %v353_v8 = vmul.f32 %v1501_v7, %v1493_v47  ;;  %v350_v9 = vpop.xlane.xlu1 %349 }
 0x39d   :  { %1502 = vrcp.f32 %v350_v9  ;;  %v1468_v9 = vld [vmem:[%s1985_s8] ss:$0 sm:$0xff] }
 0x39e   :  { %v355_v11 = vpack.c.bf16 %v353_v8, %v353_v8 }
 0x3a0   :  { %1307 = vmatmul.msk.bf16.vlgmr.msrb.gmra.mxu2 %vm219_vm9, %v355_v11 }
 0x3a3   :  { %v1503_v12 = vpop.eup %1502 }
 0x3a4   :  { %v354_v14 = vmul.f32 %v1503_v12, %v1495_v56  ;;  %v1428_v56 = vld [vmem:[%s1987_s10] sm:$0xff] }
 0x3a6   :  { %v356_v15 = vpack.c.bf16 %v354_v14, %v354_v14 }
 0x3a8   :  { %1308 = vmatmul.msk.bf16.vlgmr.msra.gmra.mxu3 %vm219_vm9, %v356_v15  ;;  %v1469_v15 = vld [vmem:[%s1986_s9] ss:$0 sm:$0xff] }
 0x40b   :  { %v262_v16 = vpop.f32.mrf.mxu3 }
 0x413   :  { %v264_v17 = vpop.f32.mrf.mxu3 }
 0x41b   :  { %v283_v20 = vpop.f32.mrf.mxu3 }
 0x423   :  { %v285_v21 = vpop.f32.mrf.mxu3  ;;  %v374_v22 = vpop.f32.mrf.mxu2 }
 0x42b   :  { %v376_v23 = vpop.f32.mrf.mxu2  ;;  %v395_v24 = vpop.f32.mrf.mxu3 }
 0x42c   :  { %v1452_v25 = vpack.i.bf16 %v395_v24, %v374_v22  ;;  %v1433_v23 = vld [vmem:[%s1989_s12 + $0x18] sm:$0xff]  ;;  %v1432_v24 = vld [vmem:[%s1989_s12 + $0x10] sm:$0xff] }
 0x42d   :  { %606 = vmatpush.bf16.msra.mxu2 %v1433_v23 }
 0x42e   :  { %1453 = vrot.lane.b32.xlu1 %v1452_v25, %s1579_s28  ;;  %v1431_v25 = vld [vmem:[%s1989_s12 + $0x8] sm:$0xff] }
 0x431   :  { %607 = vmatpush.bf16.msra.mxu2 %v1432_v24 }
 0x433   :  { %v397_v26 = vpop.f32.mrf.mxu3 }
 0x434   :  { %v1430_v26 = vld [vmem:[%s1989_s12] sm:$0xff] }
 0x435   :  { %608 = vmatpush.bf16.msra.mxu2 %v1431_v25 }
 0x439   :  { %609 = vmatpush.bf16.msra.mxu2 %v1430_v26 }
 0x4a0   :  { %v1454_v28 = vpop.permute.xlu1 %1453 }
 0x4a1   :  { %v1456_v29 = vunpack.i.h.bf16 %v1454_v28  ;;  %v1455_v30 = vunpack.i.l.bf16 %v1454_v28 }
 0x4a3   :  { %v408_v31 = vsel %vm175_vm8, %v283_v20, %v1456_v29  ;;  %v407_v32 = vsel %vm175_vm8, %v262_v16, %v1455_v30 }
 0x4a4   :  { %v409_v33 = vpack.c.bf16 %v408_v31, %v407_v32 }
 0x4a6   :  { %1317 = vmatmul.msk.bf16.vlgmr.msra.gmra.mxu0 %vm68_vm0, %v409_v33 }
 0x523   :  { %v442_v35 = vpop.f32.mrf.mxu0 }
 0x524   :  { %v443_v36 = vadd.f32 %v1467_v34, %v442_v35 }
 0x526   :  { %v447_v37 = vadd.f32 %v443_v36, %v1694_v49 }
 0x528   :  { %v451_v38 = vsel %vm68_vm0, %v447_v37, 0.0 }
 0x529   :  { %452 = vadd.xlane.f32.xlu2 %v451_v38 }
 0x52b   :  { %v444_v39 = vpop.f32.mrf.mxu0 }
 0x52c   :  { %v445_v40 = vadd.f32 %v1467_v34, %v444_v39 }
 0x52e   :  { %v448_v41 = vadd.f32 %v445_v40, %v1696_v50  ;;  %v1429_v50 = vld [vmem:[%s1987_s10 + $0x8] sm:$0xff] }
 0x52f   :  { %535 = vmatpush.bf16.msra.mxu1 %v1429_v50 }
 0x530   :  { %v454_v42 = vsel %vm68_vm0, %v448_v41, 0.0 }
 0x531   :  { %455 = vadd.xlane.f32.xlu0 %v454_v42 }
 0x533   :  { %536 = vmatpush.bf16.msra.mxu1 %v1428_v56 }
 0x59c   :  { %v453_v43 = vpop.xlane.xlu2 %452 }
 0x59d   :  { %v457_v44 = vmul.f32 %v453_v43, %v1674_v10 }
 0x59f   :  { %v459_v45 = vsub.f32 %v447_v37, %v457_v44 }
 0x5a1   :  { %v461_v46 = vmul.f32 %v459_v45, %v459_v45 }
 0x5a3   :  { %v463_v47 = vsel %vm68_vm0, %v461_v46, 0.0 }
 0x5a4   :  { %v456_v48 = vpop.xlane.xlu0 %455  ;;  %464 = vadd.xlane.f32.xlu1 %v463_v47 }
 0x5a5   :  { %v458_v49 = vmul.f32 %v456_v48, %v1674_v10 }
 0x5a7   :  { %v460_v51 = vsub.f32 %v448_v41, %v458_v49 }
 0x5a9   :  { %v462_v52 = vmul.f32 %v460_v51, %v460_v51 }
 0x5ab   :  { %v466_v53 = vsel %vm68_vm0, %v462_v52, 0.0  ;;  %v1471_v52 = vld [vmem:[%s1990_s13] ss:$0 sm:$0xff] }
 0x5ac   :  { %467 = vadd.xlane.f32.xlu2 %v466_v53 }
 0x617   :  { %v465_v54 = vpop.xlane.xlu1 %464 }
 0x618   :  { %v469_v55 = vmul.f32 %v465_v54, %v1674_v10 }
 0x61a   :  { %v471_v57 = vadd.f32 1e-12, %v469_v55 }
 0x61c   :  { %1504 = vrsqrt.f32 %v471_v57  ;;  %vm479_vm12 = vweird.f32 %v471_v57 }
 0x61f   :  { %v468_v58 = vpop.xlane.xlu2 %467 }
 0x620   :  { %v470_v59 = vmul.f32 %v468_v58, %v1674_v10 }
 0x622   :  { %v1505_v60 = vpop.eup %1504  ;;  %v472_v61 = vadd.f32 1e-12, %v470_v59 }
 0x623   :  { %v474_v62 = vmul.f32 %v1505_v60, %v471_v57  ;;  %vm480_vm11 = vweird.f32 %v1505_v60 }
 0x624   :  { %1506 = vrsqrt.f32 %v472_v61  ;;  %vm481_vm13 = vmor %vm479_vm12, %vm480_vm11  ;;  %vm489_vm15 = vweird.f32 %v472_v61 }
 0x625   :  { %v475_v63 = vmul.f32 %v1505_v60, %v474_v62 }
 0x627   :  { %v476_v0 = vmul.f32 0.5, %v475_v63 }
 0x629   :  { %v477_v1 = vsub.f32 1.5, %v476_v0 }
 0x62a   :  { %v1507_v2 = vpop.eup %1506 }
 0x62b   :  { %v478_v3 = vmul.f32 %v1505_v60, %v477_v1  ;;  %v484_v4 = vmul.f32 %v1507_v2, %v472_v61  ;;  %vm490_vm14 = vweird.f32 %v1507_v2 }
 0x62c   :  { %vm491_vm1 = vmor %vm489_vm15, %vm490_vm14  ;;  %vm1256_vm15 = vcmask 58368  }
 0x62d   :  { %v485_v5 = vmul.f32 %v1507_v2, %v484_v4  ;;  %v482_v6 = vsel %vm481_vm13, %v1505_v60, %v478_v3 }
 0x62e   :  { %v493_v11 = vmul.f32 %v482_v6, %v459_v45  ;;  %v1435_v6 = vld [vmem:[%s1981_s4 + $0x18] sm:$0xff] }
 0x62f   :  { %v486_v7 = vmul.f32 0.5, %v485_v5  ;;  %706 = vmatpush.bf16.msrb.mxu3 %v1435_v6 }
 0x630   :  { %v498_v16 = vmul.f32 %v1468_v9, %v493_v11 }
 0x631   :  { %v487_v8 = vsub.f32 1.5, %v486_v7 }
 0x632   :  { %v503_v20 = vadd.f32 %v1469_v15, %v498_v16 }
 0x633   :  { %v488_v12 = vmul.f32 %v1507_v2, %v487_v8 }
 0x635   :  { %v492_v14 = vsel %vm491_vm1, %v1507_v2, %v488_v12 }
 0x636   :  { %v494_v17 = vmul.f32 %v492_v14, %v460_v51 }
 0x638   :  { %v499_v18 = vmul.f32 %v1468_v9, %v494_v17  ;;  %v1434_v9 = vld [vmem:[%s1981_s4 + $0x10] sm:$0xff] }
 0x639   :  { %707 = vmatpush.bf16.msrb.mxu3 %v1434_v9 }
 0x63a   :  { %v504_v21 = vadd.f32 %v1469_v15, %v499_v18 }
 0x63c   :  { %v505_v22 = vpack.c.bf16 %v504_v21, %v503_v20 }
 0x63e   :  { %1326 = vmatmul.msk.bf16.vlgmr.msra.gmra.mxu1 %vm68_vm0, %v505_v22 }
 0x6bb   :  { %v538_v28 = vpop.f32.mrf.mxu1 }
 0x6bc   :  { %v539_v29 = vadd.f32 %v1470_v27, %v538_v28 }
 0x6be   :  { %v545_v30 = vmul.f32 0.044715, %v539_v29  ;;  %v543_v45 = vmul.f32 0.5, %v539_v29 }
 0x6c0   :  { %v547_v31 = vmul.f32 %v545_v30, %v539_v29 }
 0x6c2   :  { %v549_v32 = vmul.f32 %v547_v31, %v539_v29 }
 0x6c3   :  { %v540_v33 = vpop.f32.mrf.mxu1 }
 0x6c4   :  { %v551_v34 = vadd.f32 %v549_v32, %v539_v29  ;;  %v541_v35 = vadd.f32 %v1470_v27, %v540_v33  ;;  %v1472_v29 = vld [vmem:[%s1991_s14] ss:$0 sm:$0xff] }
 0x6c5   :  { %v1473_v33 = vld [vmem:[%s1992_s15] ss:$0 sm:$0xff] }
 0x6c6   :  { %v546_v36 = vmul.f32 0.044715, %v541_v35  ;;  %v553_v37 = vmul.f32 0.7978846, %v551_v34  ;;  %v544_v46 = vmul.f32 0.5, %v541_v35 }
 0x6c8   :  { %v548_v38 = vmul.f32 %v546_v36, %v541_v35  ;;  %1508 = vtanh.f32 %v553_v37 }
 0x6ca   :  { %v550_v39 = vmul.f32 %v548_v38, %v541_v35 }
 0x6cc   :  { %v552_v40 = vadd.f32 %v550_v39, %v541_v35 }
 0x6ce   :  { %v554_v41 = vmul.f32 0.7978846, %v552_v40  ;;  %v1509_v42 = vpop.eup %1508  ;;  %v1474_v40 = vld [vmem:[%s1982_s5 + $0x1] ss:$0 sm:$0xff] }
 0x6cf   :  { %v557_v43 = vadd.f32 1.0, %v1509_v42 }
 0x6d0   :  { %1510 = vtanh.f32 %v554_v41 }
 0x6d1   :  { %v559_v48 = vmul.f32 %v557_v43, %v543_v45 }
 0x6d6   :  { %v1511_v44 = vpop.eup %1510 }
 0x6d7   :  { %v558_v47 = vadd.f32 1.0, %v1511_v44 }
 0x6d9   :  { %v560_v49 = vmul.f32 %v558_v47, %v544_v46 }
 0x6db   :  { %v561_v51 = vpack.c.bf16 %v560_v49, %v559_v48 }
 0x6dd   :  { %1343 = vmatmul.msk.bf16.vlgmr.msra.gmra.mxu2 %vm598_vm2, %v561_v51 }
 0x760   :  { %v611_v53 = vpop.f32.mrf.mxu2 }
 0x761   :  { %v612_v50 = vadd.f32 %v1471_v52, %v611_v53 }
 0x763   :  { %v616_v54 = vadd.f32 %v612_v50, %v503_v20 }
 0x765   :  { %v620_v55 = vsel %vm68_vm0, %v616_v54, 0.0 }
 0x766   :  { %621 = vadd.xlane.f32.xlu0 %v620_v55 }
 0x768   :  { %v613_v56 = vpop.f32.mrf.mxu2 }
 0x769   :  { %v614_v57 = vadd.f32 %v1471_v52, %v613_v56 }
 0x76b   :  { %v617_v58 = vadd.f32 %v614_v57, %v504_v21 }
 0x76d   :  { %v623_v59 = vsel %vm68_vm0, %v617_v58, 0.0 }
 0x76e   :  { %624 = vadd.xlane.f32.xlu2 %v623_v59 }
 0x7d9   :  { %v622_v60 = vpop.xlane.xlu0 %621 }
 0x7da   :  { %v626_v61 = vmul.f32 %v622_v60, %v1674_v10 }
 0x7dc   :  { %v628_v62 = vsub.f32 %v616_v54, %v626_v61 }
 0x7de   :  { %v630_v63 = vmul.f32 %v628_v62, %v628_v62 }
 0x7e0   :  { %v632_v0 = vsel %vm68_vm0, %v630_v63, 0.0 }
 0x7e1   :  { %v625_v1 = vpop.xlane.xlu2 %624  ;;  %633 = vadd.xlane.f32.xlu0 %v632_v0 }
 0x7e2   :  { %v627_v2 = vmul.f32 %v625_v1, %v1674_v10 }
 0x7e4   :  { %v629_v3 = vsub.f32 %v617_v58, %v627_v2 }
 0x7e6   :  { %v631_v4 = vmul.f32 %v629_v3, %v629_v3 }
 0x7e8   :  { %v635_v5 = vsel %vm68_vm0, %v631_v4, 0.0 }
 0x7e9   :  { %636 = vadd.xlane.f32.xlu2 %v635_v5 }
 0x854   :  { %v634_v7 = vpop.xlane.xlu0 %633 }
 0x855   :  { %v638_v8 = vmul.f32 %v634_v7, %v1674_v10 }
 0x857   :  { %v640_v11 = vadd.f32 1e-12, %v638_v8 }
 0x859   :  { %1512 = vrsqrt.f32 %v640_v11  ;;  %vm648_vm4 = vweird.f32 %v640_v11 }
 0x85c   :  { %v637_v12 = vpop.xlane.xlu2 %636 }
 0x85d   :  { %v639_v14 = vmul.f32 %v637_v12, %v1674_v10 }
 0x85f   :  { %v1513_v15 = vpop.eup %1512  ;;  %v641_v16 = vadd.f32 1e-12, %v639_v14 }
 0x860   :  { %v643_v17 = vmul.f32 %v1513_v15, %v640_v11  ;;  %vm649_vm3 = vweird.f32 %v1513_v15 }
 0x861   :  { %1514 = vrsqrt.f32 %v641_v16  ;;  %vm650_vm5 = vmor %vm648_vm4, %vm649_vm3  ;;  %vm658_vm7 = vweird.f32 %v641_v16 }
 0x862   :  { %v644_v18 = vmul.f32 %v1513_v15, %v643_v17 }
 0x864   :  { %v645_v20 = vmul.f32 0.5, %v644_v18 }
 0x866   :  { %v646_v21 = vsub.f32 1.5, %v645_v20 }
 0x867   :  { %v1515_v22 = vpop.eup %1514 }
 0x868   :  { %v647_v23 = vmul.f32 %v1513_v15, %v646_v21  ;;  %v653_v24 = vmul.f32 %v1515_v22, %v641_v16  ;;  %vm659_vm6 = vweird.f32 %v1515_v22 }
 0x869   :  { %vm660_vm11 = vmor %vm658_vm7, %vm659_vm6  ;;  %vm1274_vm7 = vcmask 254976  }
 0x86a   :  { %v654_v25 = vmul.f32 %v1515_v22, %v653_v24  ;;  %v651_v26 = vsel %vm650_vm5, %v1513_v15, %v647_v23 }
 0x86b   :  { %v662_v30 = vmul.f32 %v651_v26, %v628_v62 }
 0x86c   :  { %v655_v27 = vmul.f32 0.5, %v654_v25 }
 0x86d   :  { %v667_v34 = vmul.f32 %v1472_v29, %v662_v30 }
 0x86e   :  { %v656_v28 = vsub.f32 1.5, %v655_v27 }
 0x86f   :  { %v1838_v37 = vadd.f32 %v1473_v33, %v667_v34 }
 0x870   :  { %v657_v31 = vmul.f32 %v1515_v22, %v656_v28 }
 0x872   :  { %v661_v32 = vsel %vm660_vm11, %v1515_v22, %v657_v31 }
 0x873   :  { %v663_v35 = vmul.f32 %v661_v32, %v629_v3 }
 0x875   :  { %v668_v36 = vmul.f32 %v1472_v29, %v663_v35 }
 0x877   :  { %v1840_v38 = vadd.f32 %v1473_v33, %v668_v36 }
 0x879   :  { %v674_v39 = vpack.c.bf16 %v1840_v38, %v1838_v37 }
 0x87b   :  { %1357 = vmatmul.msk.bf16.vlgmr.msrb.gmra.mxu3 %vm68_vm0, %v674_v39 }
 0x8fe   :  { %v709_v41 = vpop.f32.mrf.mxu3 }
 0x8ff   :  { %v710_v42 = vadd.f32 %v1474_v40, %v709_v41 }
 0x901   :  { %v714_v43 = vpack.c.bf16 %v710_v42, %v710_v42 }
 0x903   :  { %v717_v44 = vunpack.c.l.b16 %v714_v43 }
 0x905   :  { %v1848_v45 = vpack.c.b16 %v717_v44, %v717_v44 }
 0x906   :  { %v711_v46 = vpop.f32.mrf.mxu3 }
 0x907   :  { %v712_v47 = vadd.f32 %v1474_v40, %v711_v46  ;;  %832 = vrot.lane.b32.xlu2 %v1848_v45, %s1574_s3  ;;  %719 = vrot.lane.b32.xlu0 %v1848_v45, %s1575_s20 }
 0x909   :  { %v715_v48 = vpack.c.bf16 %v712_v47, %v712_v47 }
 0x90b   :  { %v741_v49 = vunpack.c.l.b16 %v715_v48 }
 0x90d   :  { %v1854_v51 = vpack.c.b16 %v741_v49, %v741_v49 }
 0x90f   :  { %743 = vrot.lane.b32.xlu1 %v1854_v51, %s1575_s20  ;;  %855 = vrot.lane.b32.xlu0 %v1854_v51, %s1574_s3 }
 0x917   :  { %830 = vrot.lane.b32.xlu1 %v1848_v45, %s1576_s21  ;;  %853 = vrot.lane.b32.xlu0 %v1854_v51, %s1576_s21 }
 0x961   :  { %v833_v52 = vpop.permute.xlu2 %832 }
 0x962   :  { %v838_v54 = vsel %vm175_vm8, %v833_v52, 0 }
 0x979   :  { %v720_v53 = vpop.permute.xlu0 %719 }
 0x97a   :  { %v725_v50 = vsel %vm175_vm8, %v720_v53, 0 }
 0x97b   :  { %734 = vmatpush.bf16.xpose.msrb.mxu0 %v725_v50 }
 0x981   :  { %v744_v55 = vpop.permute.xlu1 %743  ;;  %v856_v56 = vpop.permute.xlu0 %855 }
 0x982   :  { %v749_v57 = vsel %vm175_vm8, %v744_v55, 0  ;;  %v861_v58 = vsel %vm175_vm8, %v856_v56, 0  ;;  %1358 = vmatmul.msk.bf16.vlgmr.msrb.gmra.mxu0 %vm175_vm8, %v714_v43 }
 0x983   :  { %847 = vmatpush.bf16.xpose.msra.mxu0 %v838_v54  ;;  %758 = vmatpush.bf16.xpose.msrb.mxu1 %v749_v57 }
 0x989   :  { %v831_v59 = vpop.permute.xlu1 %830  ;;  %v854_v60 = vpop.permute.xlu0 %853 }
 0x98a   :  { %1359 = vmatmul.msk.bf16.vlgmr.msrb.gmra.mxu1 %vm175_vm8, %v715_v48 }
 0x98b   :  { %870 = vmatpush.bf16.xpose.msra.mxu1 %v861_v58 }
 0x992   :  { %1362 = vmatmul.msk.bf16.vlgmr.msra.gmra.mxu0 %vm175_vm8, %v831_v59 }
 0x99a   :  { %1363 = vmatmul.msk.bf16.vlgmr.msra.gmra.mxu1 %vm175_vm8, %v854_v60 }
 0x9ff   :  { %v736_v61 = vpop.f32.mrf.mxu0 }
 0xa00   :  { %v737_v62 = vadd.f32 %v736_v61, %v1731_v13 }
 0xa02   :  { %v764_v63 = vsel %vm219_vm9, %v737_v62, -inf }
 0xa03   :  { %765 = vmax.xlane.f32.xlu2 %v764_v63 }
 0xa07   :  { %v738_v0 = vpop.f32.mrf.mxu0  ;;  %v760_v1 = vpop.f32.mrf.mxu1 }
 0xa08   :  { %v761_v2 = vadd.f32 %v760_v1, %v1735_v19 }
 0xa0a   :  { %v767_v3 = vsel %vm219_vm9, %v761_v2, -inf }
 0xa0b   :  { %768 = vmax.xlane.f32.xlu1 %v767_v3 }
 0xa0f   :  { %v762_v4 = vpop.f32.mrf.mxu1  ;;  %v849_v5 = vpop.f32.mrf.mxu0 }
 0xa10   :  { %v850_v6 = vadd.f32 %v849_v5, %v1731_v13 }
 0xa12   :  { %v876_v7 = vsel %vm219_vm9, %v850_v6, -inf }
 0xa13   :  { %877 = vmax.xlane.f32.xlu0 %v876_v7 }
 0xa17   :  { %v851_v8 = vpop.f32.mrf.mxu0  ;;  %v872_v9 = vpop.f32.mrf.mxu1 }
 0xa18   :  { %v873_v11 = vadd.f32 %v872_v9, %v1735_v19 }
 0xa1a   :  { %v879_v12 = vsel %vm219_vm9, %v873_v11, -inf }
 0xa1b   :  { %880 = vmax.xlane.f32.xlu2 %v879_v12 }
 0xa1f   :  { %v874_v14 = vpop.f32.mrf.mxu1 }
 0xa33   :  { %788 = vrot.lane.b32.xlu2 %v1848_v45, %s1577_s24 }
 0xa3b   :  { %921 = vrot.lane.b32.xlu2 %v1854_v51, %s1578_s25 }
 0xa76   :  { %v766_v15 = vpop.xlane.xlu2 %765 }
 0xa77   :  { %v770_v16 = vsub.f32 %v737_v62, %v766_v15  ;;  %v1437_v62 = vld [vmem:[%s1983_s6 + $0x18] sm:$0xff]  ;;  %v1475_v15 = vld [vmem:[%s1984_s7 + $0x1] ss:$0 sm:$0xff] }
 0xa78   :  { %984 = vmatpush.bf16.msrb.mxu0 %v1437_v62 }
 0xa79   :  { %v772_v13 = vmul.f32 1.442695, %v770_v16 }
 0xa7b   :  { %1516 = vpow2.f32 %v772_v13 }
 0xa7e   :  { %v769_v17 = vpop.xlane.xlu1 %768 }
 0xa7f   :  { %v771_v18 = vsub.f32 %v761_v2, %v769_v17 }
 0xa81   :  { %v1517_v20 = vpop.eup %1516  ;;  %v774_v21 = vmul.f32 1.442695, %v771_v18 }
 0xa82   :  { %v776_v19 = vsel %vm219_vm9, %v1517_v20, 0.0 }
 0xa83   :  { %1518 = vpow2.f32 %v774_v21  ;;  %777 = vadd.xlane.f32.xlu1 %v776_v19 }
 0xa86   :  { %v878_v22 = vpop.xlane.xlu0 %877 }
 0xa87   :  { %v882_v23 = vsub.f32 %v850_v6, %v878_v22  ;;  %v1436_v6 = vld [vmem:[%s1983_s6 + $0x10] sm:$0xff]  ;;  %s1283_s6 = sshll.u32 %s1993_s16, 4  ;;  %s1284_s6 = int_to_ptr.hbm [resolvable:$true] %s1283_s6 }
 0xa88   :  { %985 = vmatpush.bf16.msrb.mxu0 %v1436_v6 }
 0xa89   :  { %v1519_v24 = vpop.eup %1518  ;;  %v884_v25 = vmul.f32 1.442695, %v882_v23 }
 0xa8a   :  { %v779_v26 = vsel %vm219_vm9, %v1519_v24, 0.0 }
 0xa8b   :  { %1520 = vpow2.f32 %v884_v25  ;;  %780 = vadd.xlane.f32.xlu0 %v779_v26 }
 0xa8e   :  { %v881_v27 = vpop.xlane.xlu2 %880 }
 0xa8f   :  { %v883_v28 = vsub.f32 %v873_v11, %v881_v27 }
 0xa91   :  { %v1521_v29 = vpop.eup %1520  ;;  %v886_v30 = vmul.f32 1.442695, %v883_v28 }
 0xa92   :  { %v888_v31 = vsel %vm219_vm9, %v1521_v29, 0.0 }
 0xa93   :  { %1522 = vpow2.f32 %v886_v30  ;;  %889 = vadd.xlane.f32.xlu0 %v888_v31 }
 0xa96   :  { %v789_v32 = vpop.permute.xlu2 %788 }
 0xa97   :  { %v794_v33 = vsel %vm249_vm10, %v789_v32, 0 }
 0xa98   :  { %803 = vmatpush.bf16.msrb.mxu2 %v794_v33 }
 0xa99   :  { %v1523_v34 = vpop.eup %1522 }
 0xa9a   :  { %v891_v35 = vsel %vm219_vm9, %v1523_v34, 0.0 }
 0xa9b   :  { %892 = vadd.xlane.f32.xlu0 %v891_v35 }
 0xa9c   :  { %809 = vrot.lane.b32.xlu1 %v1854_v51, %s1577_s24 }
 0xa9e   :  { %v922_v46 = vpop.permute.xlu2 %921 }
 0xa9f   :  { %v927_v51 = vsel %vm249_vm10, %v922_v46, 0 }
 0xaaf   :  { %900 = vrot.lane.b32.xlu0 %v1848_v45, %s1578_s25 }
 0xaf6   :  { %v778_v36 = vpop.xlane.xlu1 %777 }
 0xaf7   :  { %1524 = vrcp.f32 %v778_v36 }
 0xafd   :  { %v1525_v39 = vpop.eup %1524 }
 0xafe   :  { %v784_v40 = vmul.f32 %v1525_v39, %v1517_v20  ;;  %v781_v41 = vpop.xlane.xlu0 %780 }
 0xaff   :  { %1526 = vrcp.f32 %v781_v41 }
 0xb00   :  { %v786_v42 = vpack.c.bf16 %v784_v40, %v784_v40 }
 0xb02   :  { %1360 = vmatmul.msk.bf16.vlgmr.msrb.gmra.mxu2 %vm219_vm9, %v786_v42 }
 0xb05   :  { %v1527_v44 = vpop.eup %1526 }
 0xb06   :  { %v890_v43 = vpop.xlane.xlu0 %889  ;;  %v785_v47 = vmul.f32 %v1527_v44, %v1519_v24 }
 0xb08   :  { %v787_v45 = vpack.c.bf16 %v785_v47, %v785_v47 }
 0xb0e   :  { %v810_v48 = vpop.permute.xlu1 %809  ;;  %v893_v52 = vpop.xlane.xlu0 %892 }
 0xb0f   :  { %v815_v49 = vsel %vm249_vm10, %v810_v48, 0  ;;  %1528 = vrcp.f32 %v893_v52 }
 0xb10   :  { %824 = vmatpush.bf16.msra.mxu3 %v815_v49  ;;  %1530 = vrcp.f32 %v890_v43 }
 0xb13   :  { %1361 = vmatmul.msk.bf16.vlgmr.msra.gmra.mxu3 %vm219_vm9, %v787_v45 }
 0xb14   :  { %936 = vmatpush.bf16.msrb.mxu3 %v927_v51 }
 0xb15   :  { %v1529_v53 = vpop.eup %1528 }
 0xb16   :  { %v1531_v50 = vpop.eup %1530  ;;  %v897_v54 = vmul.f32 %v1529_v53, %v1523_v34  ;;  %v1438_v34 = vld [vmem:[%s1987_s10 + $0x10] sm:$0xff] }
 0xb17   :  { %v896_v55 = vmul.f32 %v1531_v50, %v1521_v29  ;;  %v1476_v50 = vld [vmem:[%s1985_s8 + $0x1] ss:$0 sm:$0xff] }
 0xb18   :  { %v899_v56 = vpack.c.bf16 %v897_v54, %v897_v54 }
 0xb19   :  { %v898_v59 = vpack.c.bf16 %v896_v55, %v896_v55 }
 0xb21   :  { %v901_v57 = vpop.permute.xlu0 %900 }
 0xb22   :  { %v906_v58 = vsel %vm249_vm10, %v901_v57, 0  ;;  %v1477_v57 = vld [vmem:[%s1986_s9 + $0x1] ss:$0 sm:$0xff] }
 0xb23   :  { %915 = vmatpush.bf16.msra.mxu2 %v906_v58  ;;  %1365 = vmatmul.msk.bf16.vlgmr.msrb.gmra.mxu3 %vm219_vm9, %v899_v56 }
 0xb26   :  { %1364 = vmatmul.msk.bf16.vlgmr.msra.gmra.mxu2 %vm219_vm9, %v898_v59 }
 0xb85   :  { %v805_v60 = vpop.f32.mrf.mxu2 }
 0xb8d   :  { %v807_v61 = vpop.f32.mrf.mxu2 }
 0xb96   :  { %v826_v63 = vpop.f32.mrf.mxu3 }
 0xb9e   :  { %v828_v0 = vpop.f32.mrf.mxu3 }
 0xb9f   :  { %v1443_v0 = vld [vmem:[%s1989_s12 + $0x38] sm:$0xff] }
 0xba0   :  { %1156 = vmatpush.bf16.msrb.mxu2 %v1443_v0 }
 0xba6   :  { %v938_v1 = vpop.f32.mrf.mxu3 }
 0xba9   :  { %v917_v2 = vpop.f32.mrf.mxu2 }
 0xbaa   :  { %v1457_v3 = vpack.i.bf16 %v938_v1, %v917_v2  ;;  %v1442_v1 = vld [vmem:[%s1989_s12 + $0x30] sm:$0xff]  ;;  %v1441_v2 = vld [vmem:[%s1989_s12 + $0x28] sm:$0xff] }
 0xbab   :  { %1157 = vmatpush.bf16.msrb.mxu2 %v1442_v1 }
 0xbac   :  { %1458 = vrot.lane.b32.xlu1 %v1457_v3, %s1579_s28  ;;  %v1440_v3 = vld [vmem:[%s1989_s12 + $0x20] sm:$0xff] }
 0xbae   :  { %v940_v4 = vpop.f32.mrf.mxu3 }
 0xbaf   :  { %1158 = vmatpush.bf16.msrb.mxu2 %v1441_v2  ;;  %v1478_v4 = vld [vmem:[%s1988_s11 + $0x1] ss:$0 sm:$0xff] }
 0xbb1   :  { %v919_v5 = vpop.f32.mrf.mxu2 }
 0xbb3   :  { %1159 = vmatpush.bf16.msrb.mxu2 %v1440_v3 }
 0xc1e   :  { %v1459_v7 = vpop.permute.xlu1 %1458 }
 0xc1f   :  { %v1461_v8 = vunpack.i.h.bf16 %v1459_v7  ;;  %v1460_v9 = vunpack.i.l.bf16 %v1459_v7 }
 0xc21   :  { %v951_v11 = vsel %vm175_vm8, %v826_v63, %v1461_v8  ;;  %v950_v12 = vsel %vm175_vm8, %v805_v60, %v1460_v9 }
 0xc22   :  { %v952_v14 = vpack.c.bf16 %v951_v11, %v950_v12 }
 0xc24   :  { %1379 = vmatmul.msk.bf16.vlgmr.msrb.gmra.mxu0 %vm68_vm0, %v952_v14 }
 0xca1   :  { %v987_v16 = vpop.f32.mrf.mxu0 }
 0xca2   :  { %v988_v13 = vadd.f32 %v1475_v15, %v987_v16 }
 0xca4   :  { %v992_v17 = vadd.f32 %v988_v13, %v1838_v37 }
 0xca6   :  { %v998_v18 = vsel %vm68_vm0, %v992_v17, 0.0 }
 0xca7   :  { %999 = vadd.xlane.f32.xlu2 %v998_v18 }
 0xca9   :  { %v989_v20 = vpop.f32.mrf.mxu0 }
 0xcaa   :  { %v990_v21 = vadd.f32 %v1475_v15, %v989_v20 }
 0xcac   :  { %v993_v19 = vadd.f32 %v990_v21, %v1840_v38  ;;  %v1439_v38 = vld [vmem:[%s1987_s10 + $0x18] sm:$0xff] }
 0xcad   :  { %1084 = vmatpush.bf16.msrb.mxu1 %v1439_v38 }
 0xcae   :  { %v1001_v22 = vsel %vm68_vm0, %v993_v19, 0.0 }
 0xcaf   :  { %1002 = vadd.xlane.f32.xlu1 %v1001_v22 }
 0xcb1   :  { %1085 = vmatpush.bf16.msrb.mxu1 %v1438_v34 }
 0xd1a   :  { %v1000_v23 = vpop.xlane.xlu2 %999 }
 0xd1b   :  { %v1004_v24 = vmul.f32 %v1000_v23, %v1674_v10 }
 0xd1d   :  { %v1006_v25 = vsub.f32 %v992_v17, %v1004_v24 }
 0xd1f   :  { %v1008_v26 = vmul.f32 %v1006_v25, %v1006_v25 }
 0xd21   :  { %v1010_v27 = vsel %vm68_vm0, %v1008_v26, 0.0 }
 0xd22   :  { %v1003_v28 = vpop.xlane.xlu1 %1002  ;;  %1011 = vadd.xlane.f32.xlu0 %v1010_v27 }
 0xd23   :  { %v1005_v37 = vmul.f32 %v1003_v28, %v1674_v10 }
 0xd25   :  { %v1007_v29 = vsub.f32 %v993_v19, %v1005_v37  ;;  %v1479_v37 = vld [vmem:[%s1990_s13 + $0x1] ss:$0 sm:$0xff] }
 0xd27   :  { %v1009_v30 = vmul.f32 %v1007_v29, %v1007_v29 }
 0xd29   :  { %v1013_v31 = vsel %vm68_vm0, %v1009_v30, 0.0 }
 0xd2a   :  { %1014 = vadd.xlane.f32.xlu2 %v1013_v31 }
 0xd95   :  { %v1012_v32 = vpop.xlane.xlu0 %1011 }
 0xd96   :  { %v1016_v33 = vmul.f32 %v1012_v32, %v1674_v10 }
 0xd98   :  { %v1018_v35 = vadd.f32 1e-12, %v1016_v33 }
 0xd9a   :  { %1532 = vrsqrt.f32 %v1018_v35  ;;  %vm1026_vm9 = vweird.f32 %v1018_v35 }
 0xd9d   :  { %v1015_v36 = vpop.xlane.xlu2 %1014 }
 0xd9e   :  { %v1017_v39 = vmul.f32 %v1015_v36, %v1674_v10  ;;  %v1227_v36 = vlaneseq }
 0xda0   :  { %v1533_v40 = vpop.eup %1532  ;;  %v1019_v41 = vadd.f32 1e-12, %v1017_v39  ;;  %v1228_v39 = vshrl.u32 %v1227_v36, 7 }
 0xda1   :  { %v1021_v42 = vmul.f32 %v1533_v40, %v1018_v35  ;;  %vm1027_vm8 = vweird.f32 %v1533_v40 }
 0xda2   :  { %1534 = vrsqrt.f32 %v1019_v41  ;;  %vm1028_vm10 = vmor %vm1026_vm9, %vm1027_vm8  ;;  %vm1036_vm13 = vweird.f32 %v1019_v41  ;;  %1463 = vset.pattern.permute.xlu0 %v1228_v39  ;;  %1462 = vset.pattern.permute.xlu2 %v1228_v39 }
 0xda3   :  { %v1022_v43 = vmul.f32 %v1533_v40, %v1021_v42 }
 0xda5   :  { %v1023_v44 = vmul.f32 0.5, %v1022_v43  ;;  %v1546_v43 = vld [vmem:[%s1978_s1] sm:$0x3] }
 0xda7   :  { %v1024_v46 = vsub.f32 1.5, %v1023_v44  ;;  %v1233_v44 = vperm.slane %v1546_v43, 1 }
 0xda8   :  { %v1535_v47 = vpop.eup %1534 }
 0xda9   :  { %v1025_v48 = vmul.f32 %v1533_v40, %v1024_v46  ;;  %v1031_v49 = vmul.f32 %v1535_v47, %v1019_v41  ;;  %vm1037_vm12 = vweird.f32 %v1535_v47 }
 0xdaa   :  { %vm1038_vm14 = vmor %vm1036_vm13, %vm1037_vm12 }
 0xdab   :  { %v1032_v51 = vmul.f32 %v1535_v47, %v1031_v49  ;;  %v1029_v45 = vsel %vm1028_vm10, %v1533_v40, %v1025_v48 }
 0xdac   :  { %v1040_v54 = vmul.f32 %v1029_v45, %v1006_v25 }
 0xdad   :  { %v1033_v52 = vmul.f32 0.5, %v1032_v51 }
 0xdae   :  { %v1045_v58 = vmul.f32 %v1476_v50, %v1040_v54 }
 0xdaf   :  { %v1034_v53 = vsub.f32 1.5, %v1033_v52  ;;  %v1257_v52 = vsel %vm1256_vm15, %v1546_v43, 0.0 }
 0xdb0   :  { %v1050_v61 = vadd.f32 %v1477_v57, %v1045_v58 }
 0xdb1   :  { %v1035_v55 = vmul.f32 %v1535_v47, %v1034_v53 }
 0xdb3   :  { %v1039_v56 = vsel %vm1038_vm14, %v1535_v47, %v1035_v55 }
 0xdb4   :  { %v1041_v59 = vmul.f32 %v1039_v56, %v1007_v29 }
 0xdb6   :  { %v1046_v60 = vmul.f32 %v1476_v50, %v1041_v59  ;;  %v1226_v50 = vperm.slane %v1546_v43, 0 }
 0xdb8   :  { %v1051_v62 = vadd.f32 %v1477_v57, %v1046_v60 }
 0xdba   :  { %v1052_v63 = vpack.c.bf16 %v1051_v62, %v1050_v61 }
 0xdbc   :  { %1395 = vmatmul.msk.bf16.vlgmr.msrb.gmra.mxu1 %vm68_vm0, %v1052_v63 }
 0xe39   :  { %v1087_v5 = vpop.f32.mrf.mxu1 }
 0xe3a   :  { %v1088_v6 = vadd.f32 %v1478_v4, %v1087_v5 }
 0xe3c   :  { %v1094_v7 = vmul.f32 0.044715, %v1088_v6  ;;  %v1092_v23 = vmul.f32 0.5, %v1088_v6 }
 0xe3e   :  { %v1096_v8 = vmul.f32 %v1094_v7, %v1088_v6 }
 0xe40   :  { %v1098_v9 = vmul.f32 %v1096_v8, %v1088_v6 }
 0xe41   :  { %v1089_v11 = vpop.f32.mrf.mxu1 }
 0xe42   :  { %v1100_v12 = vadd.f32 %v1098_v9, %v1088_v6  ;;  %v1090_v14 = vadd.f32 %v1478_v4, %v1089_v11  ;;  %v1480_v4 = vld [vmem:[%s1991_s14 + $0x1] ss:$0 sm:$0xff]  ;;  %s1580_s14 = smov [#allocation2]  }
 0xe44   :  { %v1095_v15 = vmul.f32 0.044715, %v1090_v14  ;;  %v1102_v16 = vmul.f32 0.7978846, %v1100_v12  ;;  %v1093_v24 = vmul.f32 0.5, %v1090_v14 }
 0xe46   :  { %v1097_v13 = vmul.f32 %v1095_v15, %v1090_v14  ;;  %1536 = vtanh.f32 %v1102_v16 }
 0xe48   :  { %v1099_v17 = vmul.f32 %v1097_v13, %v1090_v14 }
 0xe4a   :  { %v1101_v18 = vadd.f32 %v1099_v17, %v1090_v14 }
 0xe4c   :  { %v1103_v20 = vmul.f32 0.7978846, %v1101_v18  ;;  %v1537_v21 = vpop.eup %1536 }
 0xe4d   :  { %v1106_v19 = vadd.f32 1.0, %v1537_v21 }
 0xe4e   :  { %1538 = vtanh.f32 %v1103_v20 }
 0xe4f   :  { %v1108_v26 = vmul.f32 %v1106_v19, %v1092_v23 }
 0xe54   :  { %v1539_v22 = vpop.eup %1538 }
 0xe55   :  { %v1107_v25 = vadd.f32 1.0, %v1539_v22 }
 0xe57   :  { %v1109_v27 = vmul.f32 %v1107_v25, %v1093_v24 }
 0xe59   :  { %v1110_v28 = vpack.c.bf16 %v1109_v27, %v1108_v26 }
 0xe5b   :  { %1421 = vmatmul.msk.bf16.vlgmr.msrb.gmra.mxu2 %vm598_vm2, %v1110_v28 }
 0xede   :  { %v1161_v29 = vpop.f32.mrf.mxu2 }
 0xedf   :  { %v1162_v30 = vadd.f32 %v1479_v37, %v1161_v29 }
 0xee1   :  { %v1166_v31 = vadd.f32 %v1162_v30, %v1050_v61 }
 0xee3   :  { %v1172_v38 = vsel %vm68_vm0, %v1166_v31, 0.0 }
 0xee4   :  { %1173 = vadd.xlane.f32.xlu2 %v1172_v38 }
 0xee6   :  { %v1163_v32 = vpop.f32.mrf.mxu2 }
 0xee7   :  { %v1164_v33 = vadd.f32 %v1479_v37, %v1163_v32 }
 0xee9   :  { %v1167_v34 = vadd.f32 %v1164_v33, %v1051_v62 }
 0xeeb   :  { %v1175_v35 = vsel %vm68_vm0, %v1167_v34, 0.0 }
 0xeec   :  { %1176 = vadd.xlane.f32.xlu1 %v1175_v35 }
 0xefc   :  { %1238 = vperm.xlu2 %1462, %v1233_v44  }
 0xf57   :  { %v1174_v40 = vpop.xlane.xlu2 %1173 }
 0xf58   :  { %v1178_v41 = vmul.f32 %v1174_v40, %v1674_v10 }
 0xf5a   :  { %v1180_v42 = vsub.f32 %v1166_v31, %v1178_v41 }
 0xf5c   :  { %v1182_v46 = vmul.f32 %v1180_v42, %v1180_v42 }
 0xf5e   :  { %v1184_v47 = vsel %vm68_vm0, %v1182_v46, 0.0 }
 0xf5f   :  { %v1177_v48 = vpop.xlane.xlu1 %1176  ;;  %1185 = vadd.xlane.f32.xlu1 %v1184_v47  ;;  %v1239_v23 = vpop.permute.xlu2 %1238 }
 0xf60   :  { %v1179_v49 = vmul.f32 %v1177_v48, %v1674_v10 }
 0xf62   :  { %v1181_v51 = vsub.f32 %v1167_v34, %v1179_v49 }
 0xf64   :  { %v1183_v45 = vmul.f32 %v1181_v51, %v1181_v51 }
 0xf66   :  { %v1187_v53 = vsel %vm68_vm0, %v1183_v45, 0.0 }
 0xf67   :  { %1188 = vadd.xlane.f32.xlu0 %v1187_v53  ;;  %1258 = vadd.xlane.f32.xlu1 %v1257_v52 }
 0xf7b   :  { %1231 = vperm.xlu0 %1463, %v1226_v50  }
 0xfd2   :  { %v1186_v54 = vpop.xlane.xlu1 %1185 }
 0xfd3   :  { %v1190_v55 = vmul.f32 %v1186_v54, %v1674_v10 }
 0xfd5   :  { %v1192_v56 = vadd.f32 1e-12, %v1190_v55 }
 0xfd7   :  { %1540 = vrsqrt.f32 %v1192_v56  ;;  %vm1200_vm2 = vweird.f32 %v1192_v56 }
 0xfda   :  { %v1189_v57 = vpop.xlane.xlu0 %1188  ;;  %v1259_v22 = vpop.xlane.xlu1 %1258 }
 0xfdb   :  { %v1191_v58 = vmul.f32 %v1189_v57, %v1674_v10  ;;  %v1481_v10 = vld [vmem:[%s1992_s15 + $0x1] ss:$0 sm:$0xff]  ;;  %v1260_v25 = vmax.f32 %v1259_v22, 1e-09  ;;  %s1281_s15 = sshll.u32 %s1580_s14, 4  ;;  %s1282_s15 = int_to_ptr.vmem [resolvable:$true] %s1281_s15 }
 0xfdd   :  { %v1541_v59 = vpop.eup %1540  ;;  %v1193_v60 = vadd.f32 1e-12, %v1191_v58 }
 0xfde   :  { %v1195_v61 = vmul.f32 %v1541_v59, %v1192_v56  ;;  %vm1201_vm1 = vweird.f32 %v1541_v59 }
 0xfdf   :  { %1542 = vrsqrt.f32 %v1193_v60  ;;  %vm1202_vm3 = vmor %vm1200_vm2, %vm1201_vm1  ;;  %vm1210_vm5 = vweird.f32 %v1193_v60 }
 0xfe0   :  { %v1196_v62 = vmul.f32 %v1541_v59, %v1195_v61  ;;  %1544 = vrcp.f32 %v1260_v25 }
 0xfe2   :  { %v1197_v63 = vmul.f32 0.5, %v1196_v62 }
 0xfe4   :  { %v1198_v0 = vsub.f32 1.5, %v1197_v63 }
 0xfe5   :  { %v1543_v1 = vpop.eup %1542 }
 0xfe6   :  { %v1199_v2 = vmul.f32 %v1541_v59, %v1198_v0  ;;  %v1205_v3 = vmul.f32 %v1543_v1, %v1193_v60  ;;  %vm1211_vm4 = vweird.f32 %v1543_v1  ;;  %v1545_v33 = vpop.eup %1544 }
 0xfe7   :  { %vm1212_vm6 = vmor %vm1210_vm5, %vm1211_vm4  ;;  %v1263_v34 = vrot.slane %v1545_v33, 1 }
 0xfe8   :  { %v1206_v5 = vmul.f32 %v1543_v1, %v1205_v3  ;;  %v1203_v6 = vsel %vm1202_vm3, %v1541_v59, %v1199_v2 }
 0xfe9   :  { %v1214_v7 = vmul.f32 %v1203_v6, %v1180_v42 }
 0xfea   :  { %v1207_v8 = vmul.f32 0.5, %v1206_v5 }
 0xfeb   :  { %v1219_v9 = vmul.f32 %v1480_v4, %v1214_v7 }
 0xfec   :  { %v1208_v11 = vsub.f32 1.5, %v1207_v8 }
 0xfed   :  { %v1232_v12 = vpop.permute.xlu0 %1231  ;;  %v1224_v14 = vadd.f32 %v1481_v10, %v1219_v9 }
 0xfee   :  { %v1209_v15 = vmul.f32 %v1543_v1, %v1208_v11 }
 0xfef   :  { %v1240_v16 = vmul.f32 %v1232_v12, %v1224_v14 }
 0xff0   :  { %v1213_v13 = vsel %vm1212_vm6, %v1543_v1, %v1209_v15 }
 0xff1   :  { %v1242_v17 = vsel %vm68_vm0, %v1240_v16, 0.0  ;;  %v1215_v18 = vmul.f32 %v1213_v13, %v1181_v51 }
 0xff2   :  { %v1243_v20 = vrot.slane %v1242_v17, 4 }
 0xff3   :  { %v1220_v21 = vmul.f32 %v1480_v4, %v1215_v18 }
 0xff4   :  { %v1244_v19 = vadd.f32 %v1243_v20, %v1242_v17 }
 0xff5   :  { %v1225_v24 = vadd.f32 %v1481_v10, %v1220_v21 }
 0xff6   :  { %v1245_v27 = vrot.slane %v1244_v19, 2 }
 0xff7   :  { %v1241_v26 = vmul.f32 %v1239_v23, %v1225_v24 }
 0xff8   :  { %v1246_v29 = vadd.f32 %v1245_v27, %v1244_v19 }
 0xff9   :  { %v1249_v28 = vsel %vm68_vm0, %v1241_v26, 0.0  ;;  %vm1271_vm0 = vcmask 1041409  }
 0xffa   :  { %v1250_v37 = vrot.slane %v1249_v28, 4  ;;  %v1247_v38 = vrot.slane %v1246_v29, 1 }
 0xffc   :  { %v1251_v30 = vadd.f32 %v1250_v37, %v1249_v28  ;;  %v1248_v36 = vadd.f32 %v1247_v38, %v1246_v29 }
 0xffe   :  { %v1252_v31 = vrot.slane %v1251_v30, 2  ;;  %v1266_v41 = vmul.f32 %v1545_v33, %v1248_v36 }
0x1000   :  { %v1253_v32 = vadd.f32 %v1252_v31, %v1251_v30 }
0x1002   :  { %v1254_v35 = vrot.slane %v1253_v32, 1 }
0x1004   :  { %v1255_v39 = vadd.f32 %v1254_v35, %v1253_v32 }
0x1006   :  { %v1267_v40 = vmul.f32 %v1263_v34, %v1255_v39 }
0x1008   :  { %v1270_v42 = vrot.slane %v1267_v40, 7 }
0x100a   :  { %v1272_v43 = vsel %vm1271_vm0, %v1270_v42, %v1266_v41 }
0x100b   :  { %1275 = vst.msk [vmem:[#allocation2] sm:$0x3] %vm1274_vm7, %v1272_v43 }
0x100c   :  { %1286 = dma.vmem_to_hbm [thread:$0]  %s1282_s15, 32, %s1284_s6, [#allocation3]  }
0x100d   :  { %1571 = dma.done.wait [#allocation3], 32  }
0x100e   :  { %1572 = vsyncadd [#allocation3], 4294967264 }
0x100f   :  { %1291 = vsyncpa [#allocation3], 1 }

</bundles_post_ra>
